<compile_context>
chip_gen: v7x
topology: tpu7x:2x2x1
jax: 0.10.0
libtpu: 0.0.40
codegen_flags: <defaults>
</compile_context>

<pallas_src>
import functools
import math

import numpy as np
import jax
import jax.numpy as jnp
from jax import lax
from jax.experimental import pallas as pl
from jax.experimental.pallas import tpu as pltpu

EPS = 1e-5   # nn.BatchNorm2d default eps


def _vmem_limit():
    # Leave ~25% headroom for double-buffering / compiler scratch instead of
    # hard-coding a single number across generations.
    try:
        return int(0.75 * pltpu.get_tpu_info().vmem_capacity_bytes)
    except Exception:
        return 48 * 1024 * 1024


_VMEM_LIMIT = _vmem_limit()


def _cparams(sem):
    return pltpu.CompilerParams(dimension_semantics=sem,
                                vmem_limit_bytes=_VMEM_LIMIT)


# Parity/tap bookkeeping for ConvTranspose2d(kernel=4, stride=2, padding=1):
#   out[2m+py, 2n+px] = sum_{a,b,ic} xpad[ic, m+py+a, n+px+b]
#                                    * w[ic, oc, 3-py-2a, 3-px-2b]
# The 16 (parity, tap) pairs address only 9 distinct shifted views of the
# padded input; _TAP_SHIFT[4*p + t] maps (parity p, tap t) -> shift index.
_TAP_SHIFT = tuple((py + a) * 3 + (px + b)
                   for py in range(2) for px in range(2)
                   for a in range(2) for b in range(2))


# --------------------------------------------------------------------------
# Kernels
# --------------------------------------------------------------------------
def _fc_bn_relu_kernel(z_ref, w_ref, g_ref, b_ref, o_ref, *, num_ch, spatial):
    """ConvTranspose2d(nIn, C0, s0) on a 1x1 latent == FC matmul, fused with
    BatchNorm2d (training-mode batch statistics) + ReLU.

    z: (N, nIn) bf16, w: (nIn, C0*S) bf16, g/b: (C0, 1) f32,
    o: (N, C0*S) bf16, channel-major lanes: [c*S:(c+1)*S] is channel c.
    """
    y = jnp.dot(z_ref[...], w_ref[...],
                preferred_element_type=jnp.float32)           # (N, C0*S) f32
    nl = num_ch * spatial
    # Channel-membership mask sel[c, l] = 1.0 iff lane l belongs to channel c
    # (iota + compare only: no integer division, no reshapes, no gathers).
    lane = lax.broadcasted_iota(jnp.int32, (num_ch, nl), 1)
    low = lax.broadcasted_iota(jnp.int32, (num_ch, nl), 0) * spatial
    sel = jnp.where(jnp.logical_and(lane >= low, lane < low + spatial),
                    1.0, 0.0)                                  # (C0, nl) f32
    col_s1 = jnp.sum(y, axis=0, keepdims=True)                 # (1, nl)
    col_s2 = jnp.sum(y * y, axis=0, keepdims=True)
    inv_cnt = 1.0 / float(y.shape[0] * spatial)
    mean = jnp.sum(sel * col_s1, axis=1, keepdims=True) * inv_cnt   # (C0, 1)
    ex2 = jnp.sum(sel * col_s2, axis=1, keepdims=True) * inv_cnt
    var = jnp.maximum(ex2 - mean * mean, 0.0)
    scale = lax.rsqrt(var + EPS) * g_ref[...]                  # (C0, 1)
    shift = b_ref[...] - mean * scale
    # Broadcast per-channel affine back to lanes with a sublane reduction.
    lane_scale = jnp.sum(sel * scale, axis=0, keepdims=True)   # (1, nl)
    lane_shift = jnp.sum(sel * shift, axis=0, keepdims=True)
    o_ref[...] = jnp.maximum(y * lane_scale + lane_shift,
                             0.0).astype(o_ref.dtype)


def _convt_bn_relu_kernel(shifts_ref, w_ref, g_ref, b_ref, o_ref, acc_ref):
    """ConvTranspose2d(Cin, Cout, 4, 2, 1, bias=False) + BatchNorm2d + ReLU.

    shifts: (9, Cin, L) bf16   9 shifted views of the padded input, L = N*H*W
    w:      (16, Cout, Cin) bf16   one (Cout, Cin) matrix per (parity, tap)
    g/b:    (Cout, 1) f32
    o:      (4, Cout, L) bf16      parity-separated, lane-dense in N*H*W
    acc:    (4, Cout, L) f32       VMEM scratch holding the f32 conv result
    """
    cout, n_lane = o_ref.shape[1], o_ref.shape[2]
    s1 = jnp.zeros((cout, 1), jnp.float32)
    s2 = jnp.zeros((cout, 1), jnp.float32)
    for p in range(4):                                   # 4 output parities
        k0 = 4 * p
        y = jnp.dot(w_ref[k0], shifts_ref[_TAP_SHIFT[k0]],
                    preferred_element_type=jnp.float32)
        for t in range(1, 4):                            # accumulate 4 taps
            k = k0 + t
            y = y + jnp.dot(w_ref[k], shifts_ref[_TAP_SHIFT[k]],
                            preferred_element_type=jnp.float32)
        acc_ref[p] = y
        s1 = s1 + jnp.sum(y, axis=1, keepdims=True)      # running BN sums
        s2 = s2 + jnp.sum(y * y, axis=1, keepdims=True)
    inv_cnt = 1.0 / float(4 * n_lane)                    # N * (2H) * (2W)
    mean = s1 * inv_cnt
    var = jnp.maximum(s2 * inv_cnt - mean * mean, 0.0)
    scale = lax.rsqrt(var + EPS) * g_ref[...]            # (Cout, 1)
    shift = b_ref[...] - mean * scale
    for p in range(4):                                   # normalize + ReLU
        o_ref[p] = jnp.maximum(acc_ref[p] * scale + shift,
                               0.0).astype(o_ref.dtype)


def _convt_out_kernel(shifts_ref, w_ref, o_ref):
    """Final ConvTranspose2d (no BN / ReLU), f32 output."""
    for p in range(4):
        k0 = 4 * p
        y = jnp.dot(w_ref[k0], shifts_ref[_TAP_SHIFT[k0]],
                    preferred_element_type=jnp.float32)
        for t in range(1, 4):
            k = k0 + t
            y = y + jnp.dot(w_ref[k], shifts_ref[_TAP_SHIFT[k]],
                            preferred_element_type=jnp.float32)
        o_ref[p] = y.astype(o_ref.dtype)


# --------------------------------------------------------------------------
# Wrapper-side layout plumbing (pad / shifted views / parity interleave)
# --------------------------------------------------------------------------
def _build_shifts(x):
    """(N, Cin, H, W) -> (9, Cin, N*H*W) bf16.

    One shared padded tensor; the 9 shifted views cover all 16 parity-taps."""
    n, cin, h, w = x.shape
    xp = jnp.pad(x.astype(jnp.bfloat16), ((0, 0), (0, 0), (1, 1), (1, 1)))
    views = []
    for oy in range(3):
        for ox in range(3):
            v = xp[:, :, oy:oy + h, ox:ox + w]            # (N, Cin, H, W)
            views.append(jnp.transpose(v, (1, 0, 2, 3)).reshape(cin, n * h * w))
    return jnp.stack(views, axis=0)


def _parity_to_nchw(y, n, h, w):
    """(4, C, N*H*W) parity-separated -> (N, C, 2H, 2W)."""
    c = y.shape[1]
    y6 = y.reshape(2, 2, c, n, h, w)
    y6 = jnp.transpose(y6, (3, 2, 4, 0, 5, 1))            # (N, C, H, 2, W, 2)
    return y6.reshape(n, c, 2 * h, 2 * w)


def _prep_convt_weight(w):
    """PyTorch ConvTranspose2d weight (Cin, Cout, 4, 4) -> (16, Cout, Cin) bf16
    with flat index 4*parity + tap (matching _TAP_SHIFT order)."""
    mats = []
    for py in range(2):
        for px in range(2):
            for a in range(2):
                for b in range(2):
                    mats.append(w[:, :, 3 - py - 2 * a, 3 - px - 2 * b].T)
    return jnp.stack(mats, axis=0).astype(jnp.bfloat16)


# --------------------------------------------------------------------------
# Layer wrappers (pallas_call)
# --------------------------------------------------------------------------
def _fc_bn_relu(zf, wf, g, b, num_ch, spatial):
    n = zf.shape[0]
    nl = num_ch * spatial
    kern = functools.partial(_fc_bn_relu_kernel, num_ch=num_ch, spatial=spatial)
    return pl.pallas_call(
        kern,
        out_shape=jax.ShapeDtypeStruct((n, nl), jnp.bfloat16),
        grid_spec=pltpu.PrefetchScalarGridSpec(
            num_scalar_prefetch=0,
            grid=(1,),
            in_specs=[
                pl.BlockSpec(zf.shape, lambda i: (0, 0)),
                pl.BlockSpec(wf.shape, lambda i: (0, 0)),
                pl.BlockSpec((num_ch, 1), lambda i: (0, 0)),
                pl.BlockSpec((num_ch, 1), lambda i: (0, 0)),
            ],
            out_specs=pl.BlockSpec((n, nl), lambda i: (0, 0)),
        ),
        compiler_params=_cparams(("arbitrary",)),
    )(zf, wf, g, b)


def _convt_bn_relu_layer(x, wmats, g, b):
    """ConvTranspose2d(Cin, Cout, 4, 2, 1) + BN(batch stats) + ReLU, bf16 out."""
    n, cin, h, w = x.shape
    cout = wmats.shape[1]
    lanes = n * h * w
    shifts = _build_shifts(x)                             # (9, Cin, L) bf16
    y = pl.pallas_call(
        _convt_bn_relu_kernel,
        out_shape=jax.ShapeDtypeStruct((4, cout, lanes), jnp.bfloat16),
        grid_spec=pltpu.PrefetchScalarGridSpec(
            num_scalar_prefetch=0,
            grid=(1,),
            in_specs=[
                pl.BlockSpec((9, cin, lanes), lambda i: (0, 0, 0)),
                pl.BlockSpec((16, cout, cin), lambda i: (0, 0, 0)),
                pl.BlockSpec((cout, 1), lambda i: (0, 0)),
                pl.BlockSpec((cout, 1), lambda i: (0, 0)),
            ],
            out_specs=pl.BlockSpec((4, cout, lanes), lambda i: (0, 0, 0)),
            scratch_shapes=[pltpu.VMEM((4, cout, lanes), jnp.float32)],
        ),
        compiler_params=_cparams(("arbitrary",)),
    )(shifts, wmats, g, b)
    return _parity_to_nchw(y, n, h, w)                    # (N, Cout, 2H, 2W) bf16


def _convt_out_layer(x, wmats):
    """Final ConvTranspose2d(Cin, nOut, 4, 2, 1), f32 output."""
    n, cin, h, w = x.shape
    nout = wmats.shape[1]
    lanes = n * h * w
    shifts = _build_shifts(x)
    y = pl.pallas_call(
        _convt_out_kernel,
        out_shape=jax.ShapeDtypeStruct((4, nout, lanes), jnp.float32),
        grid_spec=pltpu.PrefetchScalarGridSpec(
            num_scalar_prefetch=0,
            grid=(1,),
            in_specs=[
                pl.BlockSpec((9, cin, lanes), lambda i: (0, 0, 0)),
                pl.BlockSpec((16, nout, cin), lambda i: (0, 0, 0)),
            ],
            out_specs=pl.BlockSpec((4, nout, lanes), lambda i: (0, 0, 0)),
        ),
        compiler_params=_cparams(("arbitrary",)),
    )(shifts, wmats)
    return _parity_to_nchw(y, n, h, w)


# --------------------------------------------------------------------------
# One-time parameter preparation (hoisted out of the per-forward path)
# --------------------------------------------------------------------------
def prepare_params(params):
    w_fc = jnp.asarray(params['w_fc'], jnp.float32)
    n_in, c0, s0, _ = w_fc.shape
    prep = {
        'w_fc': w_fc.reshape(n_in, c0 * s0 * s0).astype(jnp.bfloat16),
        'fc_gamma': jnp.asarray(params['gamma'][0], jnp.float32).reshape(c0, 1),
        'fc_beta': jnp.asarray(params['beta'][0], jnp.float32).reshape(c0, 1),
        'up': [],
        'w_out': _prep_convt_weight(jnp.asarray(params['w_out'], jnp.float32)),
    }
    for i, w in enumerate(params['w_up']):
        w = jnp.asarray(w, jnp.float32)
        cout = w.shape[1]
        prep['up'].append((
            _prep_convt_weight(w),
            jnp.asarray(params['gamma'][i + 1], jnp.float32).reshape(cout, 1),
            jnp.asarray(params['beta'][i + 1], jnp.float32).reshape(cout, 1),
        ))
    return prep


@jax.jit
def dc_decoder_forward(z, prep):
    """z: (N, nIn, 1, 1) f32 latent -> (N, nOut, sizeX, sizeX) f32."""
    n = z.shape[0]
    c0 = prep['fc_gamma'].shape[0]
    spatial = prep['w_fc'].shape[1] // c0
    s0 = math.isqrt(spatial)
    zf = z.reshape(n, -1).astype(jnp.bfloat16)
    act = _fc_bn_relu(zf, prep['w_fc'], prep['fc_gamma'], prep['fc_beta'],
                      c0, spatial)                        # (N, C0*S) bf16
    act = act.reshape(n, c0, s0, s0)
    for wmats, g, b in prep['up']:
        act = _convt_bn_relu_layer(act, wmats, g, b)      # bf16 intermediates
    return _convt_out_layer(act, prep['w_out'])           # f32 final output


# --------------------------------------------------------------------------
# Parameter init mirroring the PyTorch module construction
# --------------------------------------------------------------------------
def init_params(key, n_in, n_out, nf, n_layer, size_x):
    s0 = size_x // (2 ** n_layer)
    c = nf * (2 ** (n_layer - 1))
    keys = list(jax.random.split(key, 3 * n_layer + 4))
    ki = iter(keys)
    params = {'w_fc': jax.random.normal(next(ki), (n_in, c, s0, s0),
                                        jnp.float32) * 0.1,
              'gamma': [], 'beta': [], 'w_up': []}
    params['gamma'].append(1.0 + 0.2 * jax.random.normal(next(ki), (c,), jnp.float32))
    params['beta'].append(0.1 * jax.random.normal(next(ki), (c,), jnp.float32))
    for _ in range(1, n_layer):
        params['w_up'].append(
            jax.random.normal(next(ki), (c, c // 2, 4, 4), jnp.float32) * 0.1)
        c //= 2
        params['gamma'].append(1.0 + 0.2 * jax.random.normal(next(ki), (c,), jnp.float32))
        params['beta'].append(0.1 * jax.random.normal(next(ki), (c,), jnp.float32))
    params['w_out'] = jax.random.normal(next(ki), (c, n_out, 4, 4), jnp.float32) * 0.1
    return params


# --------------------------------------------------------------------------
# Pure numpy reference (definition-level ConvTranspose2d / BatchNorm2d)
# --------------------------------------------------------------------------
def _bf16_np(x):
    return np.asarray(jnp.asarray(np.asarray(x, np.float32),
                                  jnp.bfloat16).astype(jnp.float32))


def _ref_bn_relu(v, gamma, beta):
    mean = v.mean(axis=(0, 2, 3), keepdims=True)
    var = (v * v).mean(axis=(0, 2, 3), keepdims=True) - mean * mean
    var = np.maximum(var, 0.0)
    g = np.asarray(gamma, np.float32).reshape(1, -1, 1, 1)
    b = np.asarray(beta, np.float32).reshape(1, -1, 1, 1)
    return np.maximum((v - mean) / np.sqrt(var + EPS) * g + b, 0.0)


def _ref_conv_transpose(x, w):
    # literal ConvTranspose2d(kernel=4, stride=2, padding=1, bias=False)
    n, cin, h, wd = x.shape
    cout = w.shape[1]
    out = np.zeros((n, cout, 2 * h, 2 * wd), np.float32)
    for ky in range(4):
        for kx in range(4):
            contrib = np.einsum('nihw,io->nohw', x, w[:, :, ky, kx]).astype(np.float32)
            for iy in range(h):
                oy = 2 * iy - 1 + ky
                if oy < 0 or oy >= 2 * h:
                    continue
                for ix in range(wd):
                    ox = 2 * ix - 1 + kx
                    if ox < 0 or ox >= 2 * wd:
                        continue
                    out[:, :, oy, ox] += contrib[:, :, iy, ix]
    return out


def _ref_forward(z, params):
    zf = np.asarray(z, np.float32).reshape(z.shape[0], -1)
    act = np.einsum('ni,iohw->nohw', _bf16_np(zf),
                    _bf16_np(params['w_fc'])).astype(np.float32)
    act = _ref_bn_relu(act, params['gamma'][0], params['beta'][0])
    for i, w in enumerate(params['w_up']):
        act = _ref_conv_transpose(_bf16_np(act), _bf16_np(w))
        act = _ref_bn_relu(act, params['gamma'][i + 1], params['beta'][i + 1])
    return _ref_conv_transpose(_bf16_np(act), _bf16_np(params['w_out']))


# --------------------------------------------------------------------------
if __name__ == "__main__":
    # Small synthetic config consistent with _dcDecoder:
    # nIn=32, nOut=3, nf=4, nLayer=2, sizeX=16 ->
    #   FC: (2,32,1,1) -> (2,8,4,4) -> BN/ReLU
    #   up: (2,8,4,4)  -> (2,4,8,8) -> BN/ReLU
    #   out:(2,4,8,8)  -> (2,3,16,16)
    N, nIn, nOut, nf, nLayer, sizeX = 2, 32, 3, 4, 2, 16
    key = jax.random.PRNGKey(0)
    kp, kz = jax.random.split(key)
    params = init_params(kp, nIn, nOut, nf, nLayer, sizeX)
    z = jax.random.normal(kz, (N, nIn, 1, 1), jnp.float32)

    prep = prepare_params(params)                    # one-time weight prep
    out = jax.block_until_ready(dc_decoder_forward(z, prep))
    assert out.shape == (N, nOut, sizeX, sizeX), out.shape
    assert out.dtype == jnp.float32, out.dtype

    ref = _ref_forward(np.asarray(z), params)
    err = float(np.max(np.abs(np.asarray(out, np.float32) - ref)))
    assert np.allclose(np.asarray(out, np.float32), ref,
                       atol=2e-2, rtol=2e-2), err
    print("KERNEL_OK")
</pallas_src>

<mosaic_0001>
module attributes {stable_mosaic.version = 11 : i64} {
  func.func @_fc_bn_relu_kernel(%arg0: i32, %arg1: memref<2x32xbf16, #tpu.memory_space<vmem>>, %arg2: memref<32x128xbf16, #tpu.memory_space<vmem>>, %arg3: memref<8x1xf32, #tpu.memory_space<vmem>>, %arg4: memref<8x1xf32, #tpu.memory_space<vmem>>, %arg5: memref<2x128xbf16, #tpu.memory_space<vmem>>) attributes {dimension_semantics = [#tpu.dimension_semantics<arbitrary>], iteration_bounds = array<i64: 1>, scalar_prefetch = 0 : i64, scratch_operands = 0 : i64, tpu.core_type = #tpu.core_type<tc>, window_params = [{pipeline_mode = #tpu.pipeline_mode<synchronous>, transform_indices = @transform_0, window_bounds = array<i64: 2, 32>}, {pipeline_mode = #tpu.pipeline_mode<synchronous>, transform_indices = @transform_1, window_bounds = array<i64: 32, 128>}, {pipeline_mode = #tpu.pipeline_mode<synchronous>, transform_indices = @transform_2, window_bounds = array<i64: 8, 1>}, {pipeline_mode = #tpu.pipeline_mode<synchronous>, transform_indices = @transform_3, window_bounds = array<i64: 8, 1>}, {pipeline_mode = #tpu.pipeline_mode<synchronous>, transform_indices = @transform_4, window_bounds = array<i64: 2, 128>}]} {
    %c0 = arith.constant 0 : index
    %c0_0 = arith.constant 0 : index
    %0 = vector.load %arg1[%c0, %c0_0] : memref<2x32xbf16, #tpu.memory_space<vmem>>, vector<2x32xbf16>
    %c0_1 = arith.constant 0 : index
    %c0_2 = arith.constant 0 : index
    %1 = vector.load %arg2[%c0_1, %c0_2] : memref<32x128xbf16, #tpu.memory_space<vmem>>, vector<32x128xbf16>
    %cst = arith.constant dense<0.000000e+00> : vector<2x128xf32>
    %2 = tpu.matmul %0, %1, %cst {dimension_numbers = #tpu.dot_dimension_numbers<[1], [0], [0], [1], [0, 0, 1, 1], [], []>} : vector<2x32xbf16>, vector<32x128xbf16>, vector<2x128xf32> -> vector<2x128xf32>
    %3 = tpu.iota {dimensions = array<i32: 1>} : vector<8x128xi32>
    %4 = tpu.iota {dimensions = array<i32: 0>} : vector<8x128xi32>
    %c16_i32 = arith.constant 16 : i32
    %5 = vector.broadcast %c16_i32 : i32 to vector<8x128xi32>
    %6 = arith.muli %4, %5 : vector<8x128xi32>
    %7 = arith.cmpi sge, %3, %6 : vector<8x128xi32>
    %c16_i32_3 = arith.constant 16 : i32
    %8 = vector.broadcast %c16_i32_3 : i32 to vector<8x128xi32>
    %9 = arith.addi %6, %8 : vector<8x128xi32>
    %10 = arith.cmpi slt, %3, %9 : vector<8x128xi32>
    %11 = arith.andi %7, %10 : vector<8x128xi1>
    %cst_4 = arith.constant 1.000000e+00 : f32
    %cst_5 = arith.constant 0.000000e+00 : f32
    %12 = vector.broadcast %cst_4 : f32 to vector<8x128xf32>
    %13 = vector.broadcast %cst_5 : f32 to vector<8x128xf32>
    %14 = arith.select %11, %12, %13 : vector<8x128xi1>, vector<8x128xf32>
    %cst_6 = arith.constant dense<0.000000e+00> : vector<128xf32>
    %15 = vector.multi_reduction <add>, %2, %cst_6 [0] : vector<2x128xf32> to vector<128xf32>
    %16 = vector.shape_cast %15 : vector<128xf32> to vector<1x128xf32>
    %17 = arith.mulf %2, %2 : vector<2x128xf32>
    %cst_7 = arith.constant dense<0.000000e+00> : vector<128xf32>
    %18 = vector.multi_reduction <add>, %17, %cst_7 [0] : vector<2x128xf32> to vector<128xf32>
    %19 = vector.shape_cast %18 : vector<128xf32> to vector<1x128xf32>
    %20 = vector.broadcast %16 : vector<1x128xf32> to vector<8x128xf32>
    %21 = arith.mulf %14, %20 : vector<8x128xf32>
    %cst_8 = arith.constant dense<0.000000e+00> : vector<8xf32>
    %22 = vector.multi_reduction <add>, %21, %cst_8 [1] : vector<8x128xf32> to vector<8xf32>
    %23 = vector.shape_cast %22 : vector<8xf32> to vector<8x1xf32>
    %cst_9 = arith.constant 3.125000e-02 : f32
    %24 = vector.broadcast %cst_9 : f32 to vector<8x1xf32>
    %25 = arith.mulf %23, %24 : vector<8x1xf32>
    %26 = vector.broadcast %19 : vector<1x128xf32> to vector<8x128xf32>
    %27 = arith.mulf %14, %26 : vector<8x128xf32>
    %cst_10 = arith.constant dense<0.000000e+00> : vector<8xf32>
    %28 = vector.multi_reduction <add>, %27, %cst_10 [1] : vector<8x128xf32> to vector<8xf32>
    %29 = vector.shape_cast %28 : vector<8xf32> to vector<8x1xf32>
    %cst_11 = arith.constant 3.125000e-02 : f32
    %30 = vector.broadcast %cst_11 : f32 to vector<8x1xf32>
    %31 = arith.mulf %29, %30 : vector<8x1xf32>
    %32 = arith.mulf %25, %25 : vector<8x1xf32>
    %33 = arith.subf %31, %32 : vector<8x1xf32>
    %cst_12 = arith.constant 0.000000e+00 : f32
    %34 = vector.broadcast %cst_12 : f32 to vector<8x1xf32>
    %35 = arith.maximumf %33, %34 : vector<8x1xf32>
    %cst_13 = arith.constant 9.99999974E-6 : f32
    %36 = vector.broadcast %cst_13 : f32 to vector<8x1xf32>
    %37 = arith.addf %35, %36 : vector<8x1xf32>
    %38 = math.rsqrt %37 : vector<8x1xf32>
    %c0_14 = arith.constant 0 : index
    %c0_15 = arith.constant 0 : index
    %39 = vector.load %arg3[%c0_14, %c0_15] : memref<8x1xf32, #tpu.memory_space<vmem>>, vector<8x1xf32>
    %40 = arith.mulf %38, %39 : vector<8x1xf32>
    %c0_16 = arith.constant 0 : index
    %c0_17 = arith.constant 0 : index
    %41 = vector.load %arg4[%c0_16, %c0_17] : memref<8x1xf32, #tpu.memory_space<vmem>>, vector<8x1xf32>
    %42 = arith.mulf %25, %40 : vector<8x1xf32>
    %43 = arith.subf %41, %42 : vector<8x1xf32>
    %44 = vector.broadcast %40 : vector<8x1xf32> to vector<8x128xf32>
    %45 = arith.mulf %14, %44 : vector<8x128xf32>
    %cst_18 = arith.constant dense<0.000000e+00> : vector<128xf32>
    %46 = vector.multi_reduction <add>, %45, %cst_18 [0] : vector<8x128xf32> to vector<128xf32>
    %47 = vector.shape_cast %46 : vector<128xf32> to vector<1x128xf32>
    %48 = vector.broadcast %43 : vector<8x1xf32> to vector<8x128xf32>
    %49 = arith.mulf %14, %48 : vector<8x128xf32>
    %cst_19 = arith.constant dense<0.000000e+00> : vector<128xf32>
    %50 = vector.multi_reduction <add>, %49, %cst_19 [0] : vector<8x128xf32> to vector<128xf32>
    %51 = vector.shape_cast %50 : vector<128xf32> to vector<1x128xf32>
    %52 = vector.broadcast %47 : vector<1x128xf32> to vector<2x128xf32>
    %53 = arith.mulf %2, %52 : vector<2x128xf32>
    %54 = vector.broadcast %51 : vector<1x128xf32> to vector<2x128xf32>
    %55 = arith.addf %53, %54 : vector<2x128xf32>
    %cst_20 = arith.constant 0.000000e+00 : f32
    %56 = vector.broadcast %cst_20 : f32 to vector<2x128xf32>
    %57 = arith.maximumf %55, %56 : vector<2x128xf32>
    %58 = arith.truncf %57 : vector<2x128xf32> to vector<2x128xbf16>
    %c0_21 = arith.constant 0 : index
    %c0_22 = arith.constant 0 : index
    %59 = vector.load %arg5[%c0_21, %c0_22] : memref<2x128xbf16, #tpu.memory_space<vmem>>, vector<2x128xbf16>
    tpu.vector_store %arg5[%c0_21, %c0_22], %58 {strides = array<i32>} : memref<2x128xbf16, #tpu.memory_space<vmem>>, vector<2x128xbf16>,
    return
  }
  func.func @transform_0(%arg0: i32) -> (i32, i32) {
    %c0_i32 = arith.constant 0 : i32
    %c0_i32_0 = arith.constant 0 : i32
    %c0_i32_1 = arith.constant 0 : i32
    return %c0_i32, %c0_i32_0 : i32, i32
  }
  func.func @transform_1(%arg0: i32) -> (i32, i32) {
    %c0_i32 = arith.constant 0 : i32
    %c0_i32_0 = arith.constant 0 : i32
    %c0_i32_1 = arith.constant 0 : i32
    return %c0_i32, %c0_i32_0 : i32, i32
  }
  func.func @transform_2(%arg0: i32) -> (i32, i32) {
    %c0_i32 = arith.constant 0 : i32
    %c0_i32_0 = arith.constant 0 : i32
    %c0_i32_1 = arith.constant 0 : i32
    return %c0_i32, %c0_i32_0 : i32, i32
  }
  func.func @transform_3(%arg0: i32) -> (i32, i32) {
    %c0_i32 = arith.constant 0 : i32
    %c0_i32_0 = arith.constant 0 : i32
    %c0_i32_1 = arith.constant 0 : i32
    return %c0_i32, %c0_i32_0 : i32, i32
  }
  func.func @transform_4(%arg0: i32) -> (i32, i32) {
    %c0_i32 = arith.constant 0 : i32
    %c0_i32_0 = arith.constant 0 : i32
    %c0_i32_1 = arith.constant 0 : i32
    return %c0_i32, %c0_i32_0 : i32, i32
  }
}

module attributes {stable_mosaic.version = 11 : i64} {
  func.func @_convt_bn_relu_kernel(%arg0: i32, %arg1: memref<9x8x32xbf16, #tpu.memory_space<vmem>>, %arg2: memref<16x4x8xbf16, #tpu.memory_space<vmem>>, %arg3: memref<4x1xf32, #tpu.memory_space<vmem>>, %arg4: memref<4x1xf32, #tpu.memory_space<vmem>>, %arg5: memref<4x4x32xbf16, #tpu.memory_space<vmem>>, %arg6: memref<4x4x32xf32, #tpu.memory_space<vmem>>) attributes {dimension_semantics = [#tpu.dimension_semantics<arbitrary>], iteration_bounds = array<i64: 1>, scalar_prefetch = 0 : i64, scratch_operands = 1 : i64, tpu.core_type = #tpu.core_type<tc>, window_params = [{pipeline_mode = #tpu.pipeline_mode<synchronous>, transform_indices = @transform_0, window_bounds = array<i64: 9, 8, 32>}, {pipeline_mode = #tpu.pipeline_mode<synchronous>, transform_indices = @transform_1, window_bounds = array<i64: 16, 4, 8>}, {pipeline_mode = #tpu.pipeline_mode<synchronous>, transform_indices = @transform_2, window_bounds = array<i64: 4, 1>}, {pipeline_mode = #tpu.pipeline_mode<synchronous>, transform_indices = @transform_3, window_bounds = array<i64: 4, 1>}, {pipeline_mode = #tpu.pipeline_mode<synchronous>, transform_indices = @transform_4, window_bounds = array<i64: 4, 4, 32>}]} {
    %cst = arith.constant 0.000000e+00 : f32
    %0 = vector.broadcast %cst : f32 to vector<4x1xf32>
    %cst_0 = arith.constant 0.000000e+00 : f32
    %1 = vector.broadcast %cst_0 : f32 to vector<4x1xf32>
    %c0 = arith.constant 0 : index
    %c0_1 = arith.constant 0 : index
    %c0_2 = arith.constant 0 : index
    %2 = vector.load %arg2[%c0, %c0_1, %c0_2] : memref<16x4x8xbf16, #tpu.memory_space<vmem>>, vector<1x4x8xbf16>
    %3 = vector.shape_cast %2 : vector<1x4x8xbf16> to vector<4x8xbf16>
    %c0_3 = arith.constant 0 : index
    %c0_4 = arith.constant 0 : index
    %c0_5 = arith.constant 0 : index
    %4 = vector.load %arg1[%c0_3, %c0_4, %c0_5] : memref<9x8x32xbf16, #tpu.memory_space<vmem>>, vector<1x8x32xbf16>
    %5 = vector.shape_cast %4 : vector<1x8x32xbf16> to vector<8x32xbf16>
    %cst_6 = arith.constant dense<0.000000e+00> : vector<4x32xf32>
    %6 = tpu.matmul %3, %5, %cst_6 {dimension_numbers = #tpu.dot_dimension_numbers<[1], [0], [0], [1], [0, 0, 1, 1], [], []>} : vector<4x8xbf16>, vector<8x32xbf16>, vector<4x32xf32> -> vector<4x32xf32>
    %c1 = arith.constant 1 : index
    %c0_7 = arith.constant 0 : index
    %c0_8 = arith.constant 0 : index
    %7 = vector.load %arg2[%c1, %c0_7, %c0_8] : memref<16x4x8xbf16, #tpu.memory_space<vmem>>, vector<1x4x8xbf16>
    %8 = vector.shape_cast %7 : vector<1x4x8xbf16> to vector<4x8xbf16>
    %c1_9 = arith.constant 1 : index
    %c0_10 = arith.constant 0 : index
    %c0_11 = arith.constant 0 : index
    %9 = vector.load %arg1[%c1_9, %c0_10, %c0_11] : memref<9x8x32xbf16, #tpu.memory_space<vmem>>, vector<1x8x32xbf16>
    %10 = vector.shape_cast %9 : vector<1x8x32xbf16> to vector<8x32xbf16>
    %cst_12 = arith.constant dense<0.000000e+00> : vector<4x32xf32>
    %11 = tpu.matmul %8, %10, %cst_12 {dimension_numbers = #tpu.dot_dimension_numbers<[1], [0], [0], [1], [0, 0, 1, 1], [], []>} : vector<4x8xbf16>, vector<8x32xbf16>, vector<4x32xf32> -> vector<4x32xf32>
    %12 = arith.addf %6, %11 : vector<4x32xf32>
    %c2 = arith.constant 2 : index
    %c0_13 = arith.constant 0 : index
    %c0_14 = arith.constant 0 : index
    %13 = vector.load %arg2[%c2, %c0_13, %c0_14] : memref<16x4x8xbf16, #tpu.memory_space<vmem>>, vector<1x4x8xbf16>
    %14 = vector.shape_cast %13 : vector<1x4x8xbf16> to vector<4x8xbf16>
    %c3 = arith.constant 3 : index
    %c0_15 = arith.constant 0 : index
    %c0_16 = arith.constant 0 : index
    %15 = vector.load %arg1[%c3, %c0_15, %c0_16] : memref<9x8x32xbf16, #tpu.memory_space<vmem>>, vector<1x8x32xbf16>
    %16 = vector.shape_cast %15 : vector<1x8x32xbf16> to vector<8x32xbf16>
    %cst_17 = arith.constant dense<0.000000e+00> : vector<4x32xf32>
    %17 = tpu.matmul %14, %16, %cst_17 {dimension_numbers = #tpu.dot_dimension_numbers<[1], [0], [0], [1], [0, 0, 1, 1], [], []>} : vector<4x8xbf16>, vector<8x32xbf16>, vector<4x32xf32> -> vector<4x32xf32>
    %18 = arith.addf %12, %17 : vector<4x32xf32>
    %c3_18 = arith.constant 3 : index
    %c0_19 = arith.constant 0 : index
    %c0_20 = arith.constant 0 : index
    %19 = vector.load %arg2[%c3_18, %c0_19, %c0_20] : memref<16x4x8xbf16, #tpu.memory_space<vmem>>, vector<1x4x8xbf16>
    %20 = vector.shape_cast %19 : vector<1x4x8xbf16> to vector<4x8xbf16>
    %c4 = arith.constant 4 : index
    %c0_21 = arith.constant 0 : index
    %c0_22 = arith.constant 0 : index
    %21 = vector.load %arg1[%c4, %c0_21, %c0_22] : memref<9x8x32xbf16, #tpu.memory_space<vmem>>, vector<1x8x32xbf16>
    %22 = vector.shape_cast %21 : vector<1x8x32xbf16> to vector<8x32xbf16>
    %cst_23 = arith.constant dense<0.000000e+00> : vector<4x32xf32>
    %23 = tpu.matmul %20, %22, %cst_23 {dimension_numbers = #tpu.dot_dimension_numbers<[1], [0], [0], [1], [0, 0, 1, 1], [], []>} : vector<4x8xbf16>, vector<8x32xbf16>, vector<4x32xf32> -> vector<4x32xf32>
    %24 = arith.addf %18, %23 : vector<4x32xf32>
    %c0_24 = arith.constant 0 : index
    %c0_25 = arith.constant 0 : index
    %c0_26 = arith.constant 0 : index
    %25 = vector.load %arg6[%c0_24, %c0_25, %c0_26] : memref<4x4x32xf32, #tpu.memory_space<vmem>>, vector<1x4x32xf32>
    %26 = vector.shape_cast %25 : vector<1x4x32xf32> to vector<4x32xf32>
    %27 = vector.shape_cast %24 : vector<4x32xf32> to vector<1x4x32xf32>
    tpu.vector_store %arg6[%c0_24, %c0_25, %c0_26], %27 {strides = array<i32>} : memref<4x4x32xf32, #tpu.memory_space<vmem>>, vector<1x4x32xf32>,
    %cst_27 = arith.constant dense<0.000000e+00> : vector<4xf32>
    %28 = vector.multi_reduction <add>, %24, %cst_27 [1] : vector<4x32xf32> to vector<4xf32>
    %29 = vector.shape_cast %28 : vector<4xf32> to vector<4x1xf32>
    %30 = arith.addf %0, %29 : vector<4x1xf32>
    %31 = arith.mulf %24, %24 : vector<4x32xf32>
    %cst_28 = arith.constant dense<0.000000e+00> : vector<4xf32>
    %32 = vector.multi_reduction <add>, %31, %cst_28 [1] : vector<4x32xf32> to vector<4xf32>
    %33 = vector.shape_cast %32 : vector<4xf32> to vector<4x1xf32>
    %34 = arith.addf %1, %33 : vector<4x1xf32>
    %c4_29 = arith.constant 4 : index
    %c0_30 = arith.constant 0 : index
    %c0_31 = arith.constant 0 : index
    %35 = vector.load %arg2[%c4_29, %c0_30, %c0_31] : memref<16x4x8xbf16, #tpu.memory_space<vmem>>, vector<1x4x8xbf16>
    %36 = vector.shape_cast %35 : vector<1x4x8xbf16> to vector<4x8xbf16>
    %c1_32 = arith.constant 1 : index
    %c0_33 = arith.constant 0 : index
    %c0_34 = arith.constant 0 : index
    %37 = vector.load %arg1[%c1_32, %c0_33, %c0_34] : memref<9x8x32xbf16, #tpu.memory_space<vmem>>, vector<1x8x32xbf16>
    %38 = vector.shape_cast %37 : vector<1x8x32xbf16> to vector<8x32xbf16>
    %cst_35 = arith.constant dense<0.000000e+00> : vector<4x32xf32>
    %39 = tpu.matmul %36, %38, %cst_35 {dimension_numbers = #tpu.dot_dimension_numbers<[1], [0], [0], [1], [0, 0, 1, 1], [], []>} : vector<4x8xbf16>, vector<8x32xbf16>, vector<4x32xf32> -> vector<4x32xf32>
    %c5 = arith.constant 5 : index
    %c0_36 = arith.constant 0 : index
    %c0_37 = arith.constant 0 : index
    %40 = vector.load %arg2[%c5, %c0_36, %c0_37] : memref<16x4x8xbf16, #tpu.memory_space<vmem>>, vector<1x4x8xbf16>
    %41 = vector.shape_cast %40 : vector<1x4x8xbf16> to vector<4x8xbf16>
    %c2_38 = arith.constant 2 : index
    %c0_39 = arith.constant 0 : index
    %c0_40 = arith.constant 0 : index
    %42 = vector.load %arg1[%c2_38, %c0_39, %c0_40] : memref<9x8x32xbf16, #tpu.memory_space<vmem>>, vector<1x8x32xbf16>
    %43 = vector.shape_cast %42 : vector<1x8x32xbf16> to vector<8x32xbf16>
    %cst_41 = arith.constant dense<0.000000e+00> : vector<4x32xf32>
    %44 = tpu.matmul %41, %43, %cst_41 {dimension_numbers = #tpu.dot_dimension_numbers<[1], [0], [0], [1], [0, 0, 1, 1], [], []>} : vector<4x8xbf16>, vector<8x32xbf16>, vector<4x32xf32> -> vector<4x32xf32>
    %45 = arith.addf %39, %44 : vector<4x32xf32>
    %c6 = arith.constant 6 : index
    %c0_42 = arith.constant 0 : index
    %c0_43 = arith.constant 0 : index
    %46 = vector.load %arg2[%c6, %c0_42, %c0_43] : memref<16x4x8xbf16, #tpu.memory_space<vmem>>, vector<1x4x8xbf16>
    %47 = vector.shape_cast %46 : vector<1x4x8xbf16> to vector<4x8xbf16>
    %c4_44 = arith.constant 4 : index
    %c0_45 = arith.constant 0 : index
    %c0_46 = arith.constant 0 : index
    %48 = vector.load %arg1[%c4_44, %c0_45, %c0_46] : memref<9x8x32xbf16, #tpu.memory_space<vmem>>, vector<1x8x32xbf16>
    %49 = vector.shape_cast %48 : vector<1x8x32xbf16> to vector<8x32xbf16>
    %cst_47 = arith.constant dense<0.000000e+00> : vector<4x32xf32>
    %50 = tpu.matmul %47, %49, %cst_47 {dimension_numbers = #tpu.dot_dimension_numbers<[1], [0], [0], [1], [0, 0, 1, 1], [], []>} : vector<4x8xbf16>, vector<8x32xbf16>, vector<4x32xf32> -> vector<4x32xf32>
    %51 = arith.addf %45, %50 : vector<4x32xf32>
    %c7 = arith.constant 7 : index
    %c0_48 = arith.constant 0 : index
    %c0_49 = arith.constant 0 : index
    %52 = vector.load %arg2[%c7, %c0_48, %c0_49] : memref<16x4x8xbf16, #tpu.memory_space<vmem>>, vector<1x4x8xbf16>
    %53 = vector.shape_cast %52 : vector<1x4x8xbf16> to vector<4x8xbf16>
    %c5_50 = arith.constant 5 : index
    %c0_51 = arith.constant 0 : index
    %c0_52 = arith.constant 0 : index
    %54 = vector.load %arg1[%c5_50, %c0_51, %c0_52] : memref<9x8x32xbf16, #tpu.memory_space<vmem>>, vector<1x8x32xbf16>
    %55 = vector.shape_cast %54 : vector<1x8x32xbf16> to vector<8x32xbf16>
    %cst_53 = arith.constant dense<0.000000e+00> : vector<4x32xf32>
    %56 = tpu.matmul %53, %55, %cst_53 {dimension_numbers = #tpu.dot_dimension_numbers<[1], [0], [0], [1], [0, 0, 1, 1], [], []>} : vector<4x8xbf16>, vector<8x32xbf16>, vector<4x32xf32> -> vector<4x32xf32>
    %57 = arith.addf %51, %56 : vector<4x32xf32>
    %c1_54 = arith.constant 1 : index
    %c0_55 = arith.constant 0 : index
    %c0_56 = arith.constant 0 : index
    %58 = vector.load %arg6[%c1_54, %c0_55, %c0_56] : memref<4x4x32xf32, #tpu.memory_space<vmem>>, vector<1x4x32xf32>
    %59 = vector.shape_cast %58 : vector<1x4x32xf32> to vector<4x32xf32>
    %60 = vector.shape_cast %57 : vector<4x32xf32> to vector<1x4x32xf32>
    tpu.vector_store %arg6[%c1_54, %c0_55, %c0_56], %60 {strides = array<i32>} : memref<4x4x32xf32, #tpu.memory_space<vmem>>, vector<1x4x32xf32>,
    %cst_57 = arith.constant dense<0.000000e+00> : vector<4xf32>
    %61 = vector.multi_reduction <add>, %57, %cst_57 [1] : vector<4x32xf32> to vector<4xf32>
    %62 = vector.shape_cast %61 : vector<4xf32> to vector<4x1xf32>
    %63 = arith.addf %30, %62 : vector<4x1xf32>
    %64 = arith.mulf %57, %57 : vector<4x32xf32>
    %cst_58 = arith.constant dense<0.000000e+00> : vector<4xf32>
    %65 = vector.multi_reduction <add>, %64, %cst_58 [1] : vector<4x32xf32> to vector<4xf32>
    %66 = vector.shape_cast %65 : vector<4xf32> to vector<4x1xf32>
    %67 = arith.addf %34, %66 : vector<4x1xf32>
    %c8 = arith.constant 8 : index
    %c0_59 = arith.constant 0 : index
    %c0_60 = arith.constant 0 : index
    %68 = vector.load %arg2[%c8, %c0_59, %c0_60] : memref<16x4x8xbf16, #tpu.memory_space<vmem>>, vector<1x4x8xbf16>
    %69 = vector.shape_cast %68 : vector<1x4x8xbf16> to vector<4x8xbf16>
    %c3_61 = arith.constant 3 : index
    %c0_62 = arith.constant 0 : index
    %c0_63 = arith.constant 0 : index
    %70 = vector.load %arg1[%c3_61, %c0_62, %c0_63] : memref<9x8x32xbf16, #tpu.memory_space<vmem>>, vector<1x8x32xbf16>
    %71 = vector.shape_cast %70 : vector<1x8x32xbf16> to vector<8x32xbf16>
    %cst_64 = arith.constant dense<0.000000e+00> : vector<4x32xf32>
    %72 = tpu.matmul %69, %71, %cst_64 {dimension_numbers = #tpu.dot_dimension_numbers<[1], [0], [0], [1], [0, 0, 1, 1], [], []>} : vector<4x8xbf16>, vector<8x32xbf16>, vector<4x32xf32> -> vector<4x32xf32>
    %c9 = arith.constant 9 : index
    %c0_65 = arith.constant 0 : index
    %c0_66 = arith.constant 0 : index
    %73 = vector.load %arg2[%c9, %c0_65, %c0_66] : memref<16x4x8xbf16, #tpu.memory_space<vmem>>, vector<1x4x8xbf16>
    %74 = vector.shape_cast %73 : vector<1x4x8xbf16> to vector<4x8xbf16>
    %c4_67 = arith.constant 4 : index
    %c0_68 = arith.constant 0 : index
    %c0_69 = arith.constant 0 : index
    %75 = vector.load %arg1[%c4_67, %c0_68, %c0_69] : memref<9x8x32xbf16, #tpu.memory_space<vmem>>, vector<1x8x32xbf16>
    %76 = vector.shape_cast %75 : vector<1x8x32xbf16> to vector<8x32xbf16>
    %cst_70 = arith.constant dense<0.000000e+00> : vector<4x32xf32>
    %77 = tpu.matmul %74, %76, %cst_70 {dimension_numbers = #tpu.dot_dimension_numbers<[1], [0], [0], [1], [0, 0, 1, 1], [], []>} : vector<4x8xbf16>, vector<8x32xbf16>, vector<4x32xf32> -> vector<4x32xf32>
    %78 = arith.addf %72, %77 : vector<4x32xf32>
    %c10 = arith.constant 10 : index
    %c0_71 = arith.constant 0 : index
    %c0_72 = arith.constant 0 : index
    %79 = vector.load %arg2[%c10, %c0_71, %c0_72] : memref<16x4x8xbf16, #tpu.memory_space<vmem>>, vector<1x4x8xbf16>
    %80 = vector.shape_cast %79 : vector<1x4x8xbf16> to vector<4x8xbf16>
    %c6_73 = arith.constant 6 : index
    %c0_74 = arith.constant 0 : index
    %c0_75 = arith.constant 0 : index
    %81 = vector.load %arg1[%c6_73, %c0_74, %c0_75] : memref<9x8x32xbf16, #tpu.memory_space<vmem>>, vector<1x8x32xbf16>
    %82 = vector.shape_cast %81 : vector<1x8x32xbf16> to vector<8x32xbf16>
    %cst_76 = arith.constant dense<0.000000e+00> : vector<4x32xf32>
    %83 = tpu.matmul %80, %82, %cst_76 {dimension_numbers = #tpu.dot_dimension_numbers<[1], [0], [0], [1], [0, 0, 1, 1], [], []>} : vector<4x8xbf16>, vector<8x32xbf16>, vector<4x32xf32> -> vector<4x32xf32>
    %84 = arith.addf %78, %83 : vector<4x32xf32>
    %c11 = arith.constant 11 : index
    %c0_77 = arith.constant 0 : index
    %c0_78 = arith.constant 0 : index
    %85 = vector.load %arg2[%c11, %c0_77, %c0_78] : memref<16x4x8xbf16, #tpu.memory_space<vmem>>, vector<1x4x8xbf16>
    %86 = vector.shape_cast %85 : vector<1x4x8xbf16> to vector<4x8xbf16>
    %c7_79 = arith.constant 7 : index
    %c0_80 = arith.constant 0 : index
    %c0_81 = arith.constant 0 : index
    %87 = vector.load %arg1[%c7_79, %c0_80, %c0_81] : memref<9x8x32xbf16, #tpu.memory_space<vmem>>, vector<1x8x32xbf16>
    %88 = vector.shape_cast %87 : vector<1x8x32xbf16> to vector<8x32xbf16>
    %cst_82 = arith.constant dense<0.000000e+00> : vector<4x32xf32>
    %89 = tpu.matmul %86, %88, %cst_82 {dimension_numbers = #tpu.dot_dimension_numbers<[1], [0], [0], [1], [0, 0, 1, 1], [], []>} : vector<4x8xbf16>, vector<8x32xbf16>, vector<4x32xf32> -> vector<4x32xf32>
    %90 = arith.addf %84, %89 : vector<4x32xf32>
    %c2_83 = arith.constant 2 : index
    %c0_84 = arith.constant 0 : index
    %c0_85 = arith.constant 0 : index
    %91 = vector.load %arg6[%c2_83, %c0_84, %c0_85] : memref<4x4x32xf32, #tpu.memory_space<vmem>>, vector<1x4x32xf32>
    %92 = vector.shape_cast %91 : vector<1x4x32xf32> to vector<4x32xf32>
    %93 = vector.shape_cast %90 : vector<4x32xf32> to vector<1x4x32xf32>
    tpu.vector_store %arg6[%c2_83, %c0_84, %c0_85], %93 {strides = array<i32>} : memref<4x4x32xf32, #tpu.memory_space<vmem>>, vector<1x4x32xf32>,
    %cst_86 = arith.constant dense<0.000000e+00> : vector<4xf32>
    %94 = vector.multi_reduction <add>, %90, %cst_86 [1] : vector<4x32xf32> to vector<4xf32>
    %95 = vector.shape_cast %94 : vector<4xf32> to vector<4x1xf32>
    %96 = arith.addf %63, %95 : vector<4x1xf32>
    %97 = arith.mulf %90, %90 : vector<4x32xf32>
    %cst_87 = arith.constant dense<0.000000e+00> : vector<4xf32>
    %98 = vector.multi_reduction <add>, %97, %cst_87 [1] : vector<4x32xf32> to vector<4xf32>
    %99 = vector.shape_cast %98 : vector<4xf32> to vector<4x1xf32>
    %100 = arith.addf %67, %99 : vector<4x1xf32>
    %c12 = arith.constant 12 : index
    %c0_88 = arith.constant 0 : index
    %c0_89 = arith.constant 0 : index
    %101 = vector.load %arg2[%c12, %c0_88, %c0_89] : memref<16x4x8xbf16, #tpu.memory_space<vmem>>, vector<1x4x8xbf16>
    %102 = vector.shape_cast %101 : vector<1x4x8xbf16> to vector<4x8xbf16>
    %c4_90 = arith.constant 4 : index
    %c0_91 = arith.constant 0 : index
    %c0_92 = arith.constant 0 : index
    %103 = vector.load %arg1[%c4_90, %c0_91, %c0_92] : memref<9x8x32xbf16, #tpu.memory_space<vmem>>, vector<1x8x32xbf16>
    %104 = vector.shape_cast %103 : vector<1x8x32xbf16> to vector<8x32xbf16>
    %cst_93 = arith.constant dense<0.000000e+00> : vector<4x32xf32>
    %105 = tpu.matmul %102, %104, %cst_93 {dimension_numbers = #tpu.dot_dimension_numbers<[1], [0], [0], [1], [0, 0, 1, 1], [], []>} : vector<4x8xbf16>, vector<8x32xbf16>, vector<4x32xf32> -> vector<4x32xf32>
    %c13 = arith.constant 13 : index
    %c0_94 = arith.constant 0 : index
    %c0_95 = arith.constant 0 : index
    %106 = vector.load %arg2[%c13, %c0_94, %c0_95] : memref<16x4x8xbf16, #tpu.memory_space<vmem>>, vector<1x4x8xbf16>
    %107 = vector.shape_cast %106 : vector<1x4x8xbf16> to vector<4x8xbf16>
    %c5_96 = arith.constant 5 : index
    %c0_97 = arith.constant 0 : index
    %c0_98 = arith.constant 0 : index
    %108 = vector.load %arg1[%c5_96, %c0_97, %c0_98] : memref<9x8x32xbf16, #tpu.memory_space<vmem>>, vector<1x8x32xbf16>
    %109 = vector.shape_cast %108 : vector<1x8x32xbf16> to vector<8x32xbf16>
    %cst_99 = arith.constant dense<0.000000e+00> : vector<4x32xf32>
    %110 = tpu.matmul %107, %109, %cst_99 {dimension_numbers = #tpu.dot_dimension_numbers<[1], [0], [0], [1], [0, 0, 1, 1], [], []>} : vector<4x8xbf16>, vector<8x32xbf16>, vector<4x32xf32> -> vector<4x32xf32>
    %111 = arith.addf %105, %110 : vector<4x32xf32>
    %c14 = arith.constant 14 : index
    %c0_100 = arith.constant 0 : index
    %c0_101 = arith.constant 0 : index
    %112 = vector.load %arg2[%c14, %c0_100, %c0_101] : memref<16x4x8xbf16, #tpu.memory_space<vmem>>, vector<1x4x8xbf16>
    %113 = vector.shape_cast %112 : vector<1x4x8xbf16> to vector<4x8xbf16>
    %c7_102 = arith.constant 7 : index
    %c0_103 = arith.constant 0 : index
    %c0_104 = arith.constant 0 : index
    %114 = vector.load %arg1[%c7_102, %c0_103, %c0_104] : memref<9x8x32xbf16, #tpu.memory_space<vmem>>, vector<1x8x32xbf16>
    %115 = vector.shape_cast %114 : vector<1x8x32xbf16> to vector<8x32xbf16>
    %cst_105 = arith.constant dense<0.000000e+00> : vector<4x32xf32>
    %116 = tpu.matmul %113, %115, %cst_105 {dimension_numbers = #tpu.dot_dimension_numbers<[1], [0], [0], [1], [0, 0, 1, 1], [], []>} : vector<4x8xbf16>, vector<8x32xbf16>, vector<4x32xf32> -> vector<4x32xf32>
    %117 = arith.addf %111, %116 : vector<4x32xf32>
    %c15 = arith.constant 15 : index
    %c0_106 = arith.constant 0 : index
    %c0_107 = arith.constant 0 : index
    %118 = vector.load %arg2[%c15, %c0_106, %c0_107] : memref<16x4x8xbf16, #tpu.memory_space<vmem>>, vector<1x4x8xbf16>
    %119 = vector.shape_cast %118 : vector<1x4x8xbf16> to vector<4x8xbf16>
    %c8_108 = arith.constant 8 : index
    %c0_109 = arith.constant 0 : index
    %c0_110 = arith.constant 0 : index
    %120 = vector.load %arg1[%c8_108, %c0_109, %c0_110] : memref<9x8x32xbf16, #tpu.memory_space<vmem>>, vector<1x8x32xbf16>
    %121 = vector.shape_cast %120 : vector<1x8x32xbf16> to vector<8x32xbf16>
    %cst_111 = arith.constant dense<0.000000e+00> : vector<4x32xf32>
    %122 = tpu.matmul %119, %121, %cst_111 {dimension_numbers = #tpu.dot_dimension_numbers<[1], [0], [0], [1], [0, 0, 1, 1], [], []>} : vector<4x8xbf16>, vector<8x32xbf16>, vector<4x32xf32> -> vector<4x32xf32>
    %123 = arith.addf %117, %122 : vector<4x32xf32>
    %c3_112 = arith.constant 3 : index
    %c0_113 = arith.constant 0 : index
    %c0_114 = arith.constant 0 : index
    %124 = vector.load %arg6[%c3_112, %c0_113, %c0_114] : memref<4x4x32xf32, #tpu.memory_space<vmem>>, vector<1x4x32xf32>
    %125 = vector.shape_cast %124 : vector<1x4x32xf32> to vector<4x32xf32>
    %126 = vector.shape_cast %123 : vector<4x32xf32> to vector<1x4x32xf32>
    tpu.vector_store %arg6[%c3_112, %c0_113, %c0_114], %126 {strides = array<i32>} : memref<4x4x32xf32, #tpu.memory_space<vmem>>, vector<1x4x32xf32>,
    %cst_115 = arith.constant dense<0.000000e+00> : vector<4xf32>
    %127 = vector.multi_reduction <add>, %123, %cst_115 [1] : vector<4x32xf32> to vector<4xf32>
    %128 = vector.shape_cast %127 : vector<4xf32> to vector<4x1xf32>
    %129 = arith.addf %96, %128 : vector<4x1xf32>
    %130 = arith.mulf %123, %123 : vector<4x32xf32>
    %cst_116 = arith.constant dense<0.000000e+00> : vector<4xf32>
    %131 = vector.multi_reduction <add>, %130, %cst_116 [1] : vector<4x32xf32> to vector<4xf32>
    %132 = vector.shape_cast %131 : vector<4xf32> to vector<4x1xf32>
    %133 = arith.addf %100, %132 : vector<4x1xf32>
    %cst_117 = arith.constant 7.812500e-03 : f32
    %134 = vector.broadcast %cst_117 : f32 to vector<4x1xf32>
    %135 = arith.mulf %129, %134 : vector<4x1xf32>
    %cst_118 = arith.constant 7.812500e-03 : f32
    %136 = vector.broadcast %cst_118 : f32 to vector<4x1xf32>
    %137 = arith.mulf %133, %136 : vector<4x1xf32>
    %138 = arith.mulf %135, %135 : vector<4x1xf32>
    %139 = arith.subf %137, %138 : vector<4x1xf32>
    %cst_119 = arith.constant 0.000000e+00 : f32
    %140 = vector.broadcast %cst_119 : f32 to vector<4x1xf32>
    %141 = arith.maximumf %139, %140 : vector<4x1xf32>
    %cst_120 = arith.constant 9.99999974E-6 : f32
    %142 = vector.broadcast %cst_120 : f32 to vector<4x1xf32>
    %143 = arith.addf %141, %142 : vector<4x1xf32>
    %144 = math.rsqrt %143 : vector<4x1xf32>
    %c0_121 = arith.constant 0 : index
    %c0_122 = arith.constant 0 : index
    %145 = vector.load %arg3[%c0_121, %c0_122] : memref<4x1xf32, #tpu.memory_space<vmem>>, vector<4x1xf32>
    %146 = arith.mulf %144, %145 : vector<4x1xf32>
    %c0_123 = arith.constant 0 : index
    %c0_124 = arith.constant 0 : index
    %147 = vector.load %arg4[%c0_123, %c0_124] : memref<4x1xf32, #tpu.memory_space<vmem>>, vector<4x1xf32>
    %148 = arith.mulf %135, %146 : vector<4x1xf32>
    %149 = arith.subf %147, %148 : vector<4x1xf32>
    %c0_125 = arith.constant 0 : index
    %c0_126 = arith.constant 0 : index
    %c0_127 = arith.constant 0 : index
    %150 = vector.load %arg6[%c0_125, %c0_126, %c0_127] : memref<4x4x32xf32, #tpu.memory_space<vmem>>, vector<1x4x32xf32>
    %151 = vector.shape_cast %150 : vector<1x4x32xf32> to vector<4x32xf32>
    %152 = vector.broadcast %146 : vector<4x1xf32> to vector<4x32xf32>
    %153 = arith.mulf %151, %152 : vector<4x32xf32>
    %154 = vector.broadcast %149 : vector<4x1xf32> to vector<4x32xf32>
    %155 = arith.addf %153, %154 : vector<4x32xf32>
    %cst_128 = arith.constant 0.000000e+00 : f32
    %156 = vector.broadcast %cst_128 : f32 to vector<4x32xf32>
    %157 = arith.maximumf %155, %156 : vector<4x32xf32>
    %158 = arith.truncf %157 : vector<4x32xf32> to vector<4x32xbf16>
    %c0_129 = arith.constant 0 : index
    %c0_130 = arith.constant 0 : index
    %c0_131 = arith.constant 0 : index
    %159 = vector.load %arg5[%c0_129, %c0_130, %c0_131] : memref<4x4x32xbf16, #tpu.memory_space<vmem>>, vector<1x4x32xbf16>
    %160 = vector.shape_cast %159 : vector<1x4x32xbf16> to vector<4x32xbf16>
    %161 = vector.shape_cast %158 : vector<4x32xbf16> to vector<1x4x32xbf16>
    tpu.vector_store %arg5[%c0_129, %c0_130, %c0_131], %161 {strides = array<i32>} : memref<4x4x32xbf16, #tpu.memory_space<vmem>>, vector<1x4x32xbf16>,
    %c1_132 = arith.constant 1 : index
    %c0_133 = arith.constant 0 : index
    %c0_134 = arith.constant 0 : index
    %162 = vector.load %arg6[%c1_132, %c0_133, %c0_134] : memref<4x4x32xf32, #tpu.memory_space<vmem>>, vector<1x4x32xf32>
    %163 = vector.shape_cast %162 : vector<1x4x32xf32> to vector<4x32xf32>
    %164 = vector.broadcast %146 : vector<4x1xf32> to vector<4x32xf32>
    %165 = arith.mulf %163, %164 : vector<4x32xf32>
    %166 = vector.broadcast %149 : vector<4x1xf32> to vector<4x32xf32>
    %167 = arith.addf %165, %166 : vector<4x32xf32>
    %cst_135 = arith.constant 0.000000e+00 : f32
    %168 = vector.broadcast %cst_135 : f32 to vector<4x32xf32>
    %169 = arith.maximumf %167, %168 : vector<4x32xf32>
    %170 = arith.truncf %169 : vector<4x32xf32> to vector<4x32xbf16>
    %c1_136 = arith.constant 1 : index
    %c0_137 = arith.constant 0 : index
    %c0_138 = arith.constant 0 : index
    %171 = vector.load %arg5[%c1_136, %c0_137, %c0_138] : memref<4x4x32xbf16, #tpu.memory_space<vmem>>, vector<1x4x32xbf16>
    %172 = vector.shape_cast %171 : vector<1x4x32xbf16> to vector<4x32xbf16>
    %173 = vector.shape_cast %170 : vector<4x32xbf16> to vector<1x4x32xbf16>
    tpu.vector_store %arg5[%c1_136, %c0_137, %c0_138], %173 {strides = array<i32>} : memref<4x4x32xbf16, #tpu.memory_space<vmem>>, vector<1x4x32xbf16>,
    %c2_139 = arith.constant 2 : index
    %c0_140 = arith.constant 0 : index
    %c0_141 = arith.constant 0 : index
    %174 = vector.load %arg6[%c2_139, %c0_140, %c0_141] : memref<4x4x32xf32, #tpu.memory_space<vmem>>, vector<1x4x32xf32>
    %175 = vector.shape_cast %174 : vector<1x4x32xf32> to vector<4x32xf32>
    %176 = vector.broadcast %146 : vector<4x1xf32> to vector<4x32xf32>
    %177 = arith.mulf %175, %176 : vector<4x32xf32>
    %178 = vector.broadcast %149 : vector<4x1xf32> to vector<4x32xf32>
    %179 = arith.addf %177, %178 : vector<4x32xf32>
    %cst_142 = arith.constant 0.000000e+00 : f32
    %180 = vector.broadcast %cst_142 : f32 to vector<4x32xf32>
    %181 = arith.maximumf %179, %180 : vector<4x32xf32>
    %182 = arith.truncf %181 : vector<4x32xf32> to vector<4x32xbf16>
    %c2_143 = arith.constant 2 : index
    %c0_144 = arith.constant 0 : index
    %c0_145 = arith.constant 0 : index
    %183 = vector.load %arg5[%c2_143, %c0_144, %c0_145] : memref<4x4x32xbf16, #tpu.memory_space<vmem>>, vector<1x4x32xbf16>
    %184 = vector.shape_cast %183 : vector<1x4x32xbf16> to vector<4x32xbf16>
    %185 = vector.shape_cast %182 : vector<4x32xbf16> to vector<1x4x32xbf16>
    tpu.vector_store %arg5[%c2_143, %c0_144, %c0_145], %185 {strides = array<i32>} : memref<4x4x32xbf16, #tpu.memory_space<vmem>>, vector<1x4x32xbf16>,
    %c3_146 = arith.constant 3 : index
    %c0_147 = arith.constant 0 : index
    %c0_148 = arith.constant 0 : index
    %186 = vector.load %arg6[%c3_146, %c0_147, %c0_148] : memref<4x4x32xf32, #tpu.memory_space<vmem>>, vector<1x4x32xf32>
    %187 = vector.shape_cast %186 : vector<1x4x32xf32> to vector<4x32xf32>
    %188 = vector.broadcast %146 : vector<4x1xf32> to vector<4x32xf32>
    %189 = arith.mulf %187, %188 : vector<4x32xf32>
    %190 = vector.broadcast %149 : vector<4x1xf32> to vector<4x32xf32>
    %191 = arith.addf %189, %190 : vector<4x32xf32>
    %cst_149 = arith.constant 0.000000e+00 : f32
    %192 = vector.broadcast %cst_149 : f32 to vector<4x32xf32>
    %193 = arith.maximumf %191, %192 : vector<4x32xf32>
    %194 = arith.truncf %193 : vector<4x32xf32> to vector<4x32xbf16>
    %c3_150 = arith.constant 3 : index
    %c0_151 = arith.constant 0 : index
    %c0_152 = arith.constant 0 : index
    %195 = vector.load %arg5[%c3_150, %c0_151, %c0_152] : memref<4x4x32xbf16, #tpu.memory_space<vmem>>, vector<1x4x32xbf16>
    %196 = vector.shape_cast %195 : vector<1x4x32xbf16> to vector<4x32xbf16>
    %197 = vector.shape_cast %194 : vector<4x32xbf16> to vector<1x4x32xbf16>
    tpu.vector_store %arg5[%c3_150, %c0_151, %c0_152], %197 {strides = array<i32>} : memref<4x4x32xbf16, #tpu.memory_space<vmem>>, vector<1x4x32xbf16>,
    return
  }
  func.func @transform_0(%arg0: i32) -> (i32, i32, i32) {
    %c0_i32 = arith.constant 0 : i32
    %c0_i32_0 = arith.constant 0 : i32
    %c0_i32_1 = arith.constant 0 : i32
    %c0_i32_2 = arith.constant 0 : i32
    return %c0_i32, %c0_i32_0, %c0_i32_1 : i32, i32, i32
  }
  func.func @transform_1(%arg0: i32) -> (i32, i32, i32) {
    %c0_i32 = arith.constant 0 : i32
    %c0_i32_0 = arith.constant 0 : i32
    %c0_i32_1 = arith.constant 0 : i32
    %c0_i32_2 = arith.constant 0 : i32
    return %c0_i32, %c0_i32_0, %c0_i32_1 : i32, i32, i32
  }
  func.func @transform_2(%arg0: i32) -> (i32, i32) {
    %c0_i32 = arith.constant 0 : i32
    %c0_i32_0 = arith.constant 0 : i32
    %c0_i32_1 = arith.constant 0 : i32
    return %c0_i32, %c0_i32_0 : i32, i32
  }
  func.func @transform_3(%arg0: i32) -> (i32, i32) {
    %c0_i32 = arith.constant 0 : i32
    %c0_i32_0 = arith.constant 0 : i32
    %c0_i32_1 = arith.constant 0 : i32
    return %c0_i32, %c0_i32_0 : i32, i32
  }
  func.func @transform_4(%arg0: i32) -> (i32, i32, i32) {
    %c0_i32 = arith.constant 0 : i32
    %c0_i32_0 = arith.constant 0 : i32
    %c0_i32_1 = arith.constant 0 : i32
    %c0_i32_2 = arith.constant 0 : i32
    return %c0_i32, %c0_i32_0, %c0_i32_1 : i32, i32, i32
  }
}

module attributes {stable_mosaic.version = 11 : i64} {
  func.func @_convt_out_kernel(%arg0: i32, %arg1: memref<9x4x128xbf16, #tpu.memory_space<vmem>>, %arg2: memref<16x3x4xbf16, #tpu.memory_space<vmem>>, %arg3: memref<4x3x128xf32, #tpu.memory_space<vmem>>) attributes {dimension_semantics = [#tpu.dimension_semantics<arbitrary>], iteration_bounds = array<i64: 1>, scalar_prefetch = 0 : i64, scratch_operands = 0 : i64, tpu.core_type = #tpu.core_type<tc>, window_params = [{pipeline_mode = #tpu.pipeline_mode<synchronous>, transform_indices = @transform_0, window_bounds = array<i64: 9, 4, 128>}, {pipeline_mode = #tpu.pipeline_mode<synchronous>, transform_indices = @transform_1, window_bounds = array<i64: 16, 3, 4>}, {pipeline_mode = #tpu.pipeline_mode<synchronous>, transform_indices = @transform_2, window_bounds = array<i64: 4, 3, 128>}]} {
    %c0 = arith.constant 0 : index
    %c0_0 = arith.constant 0 : index
    %c0_1 = arith.constant 0 : index
    %0 = vector.load %arg2[%c0, %c0_0, %c0_1] : memref<16x3x4xbf16, #tpu.memory_space<vmem>>, vector<1x3x4xbf16>
    %1 = vector.shape_cast %0 : vector<1x3x4xbf16> to vector<3x4xbf16>
    %c0_2 = arith.constant 0 : index
    %c0_3 = arith.constant 0 : index
    %c0_4 = arith.constant 0 : index
    %2 = vector.load %arg1[%c0_2, %c0_3, %c0_4] : memref<9x4x128xbf16, #tpu.memory_space<vmem>>, vector<1x4x128xbf16>
    %3 = vector.shape_cast %2 : vector<1x4x128xbf16> to vector<4x128xbf16>
    %cst = arith.constant dense<0.000000e+00> : vector<3x128xf32>
    %4 = tpu.matmul %1, %3, %cst {dimension_numbers = #tpu.dot_dimension_numbers<[1], [0], [0], [1], [0, 0, 1, 1], [], []>} : vector<3x4xbf16>, vector<4x128xbf16>, vector<3x128xf32> -> vector<3x128xf32>
    %c1 = arith.constant 1 : index
    %c0_5 = arith.constant 0 : index
    %c0_6 = arith.constant 0 : index
    %5 = vector.load %arg2[%c1, %c0_5, %c0_6] : memref<16x3x4xbf16, #tpu.memory_space<vmem>>, vector<1x3x4xbf16>
    %6 = vector.shape_cast %5 : vector<1x3x4xbf16> to vector<3x4xbf16>
    %c1_7 = arith.constant 1 : index
    %c0_8 = arith.constant 0 : index
    %c0_9 = arith.constant 0 : index
    %7 = vector.load %arg1[%c1_7, %c0_8, %c0_9] : memref<9x4x128xbf16, #tpu.memory_space<vmem>>, vector<1x4x128xbf16>
    %8 = vector.shape_cast %7 : vector<1x4x128xbf16> to vector<4x128xbf16>
    %cst_10 = arith.constant dense<0.000000e+00> : vector<3x128xf32>
    %9 = tpu.matmul %6, %8, %cst_10 {dimension_numbers = #tpu.dot_dimension_numbers<[1], [0], [0], [1], [0, 0, 1, 1], [], []>} : vector<3x4xbf16>, vector<4x128xbf16>, vector<3x128xf32> -> vector<3x128xf32>
    %10 = arith.addf %4, %9 : vector<3x128xf32>
    %c2 = arith.constant 2 : index
    %c0_11 = arith.constant 0 : index
    %c0_12 = arith.constant 0 : index
    %11 = vector.load %arg2[%c2, %c0_11, %c0_12] : memref<16x3x4xbf16, #tpu.memory_space<vmem>>, vector<1x3x4xbf16>
    %12 = vector.shape_cast %11 : vector<1x3x4xbf16> to vector<3x4xbf16>
    %c3 = arith.constant 3 : index
    %c0_13 = arith.constant 0 : index
    %c0_14 = arith.constant 0 : index
    %13 = vector.load %arg1[%c3, %c0_13, %c0_14] : memref<9x4x128xbf16, #tpu.memory_space<vmem>>, vector<1x4x128xbf16>
    %14 = vector.shape_cast %13 : vector<1x4x128xbf16> to vector<4x128xbf16>
    %cst_15 = arith.constant dense<0.000000e+00> : vector<3x128xf32>
    %15 = tpu.matmul %12, %14, %cst_15 {dimension_numbers = #tpu.dot_dimension_numbers<[1], [0], [0], [1], [0, 0, 1, 1], [], []>} : vector<3x4xbf16>, vector<4x128xbf16>, vector<3x128xf32> -> vector<3x128xf32>
    %16 = arith.addf %10, %15 : vector<3x128xf32>
    %c3_16 = arith.constant 3 : index
    %c0_17 = arith.constant 0 : index
    %c0_18 = arith.constant 0 : index
    %17 = vector.load %arg2[%c3_16, %c0_17, %c0_18] : memref<16x3x4xbf16, #tpu.memory_space<vmem>>, vector<1x3x4xbf16>
    %18 = vector.shape_cast %17 : vector<1x3x4xbf16> to vector<3x4xbf16>
    %c4 = arith.constant 4 : index
    %c0_19 = arith.constant 0 : index
    %c0_20 = arith.constant 0 : index
    %19 = vector.load %arg1[%c4, %c0_19, %c0_20] : memref<9x4x128xbf16, #tpu.memory_space<vmem>>, vector<1x4x128xbf16>
    %20 = vector.shape_cast %19 : vector<1x4x128xbf16> to vector<4x128xbf16>
    %cst_21 = arith.constant dense<0.000000e+00> : vector<3x128xf32>
    %21 = tpu.matmul %18, %20, %cst_21 {dimension_numbers = #tpu.dot_dimension_numbers<[1], [0], [0], [1], [0, 0, 1, 1], [], []>} : vector<3x4xbf16>, vector<4x128xbf16>, vector<3x128xf32> -> vector<3x128xf32>
    %22 = arith.addf %16, %21 : vector<3x128xf32>
    %c0_22 = arith.constant 0 : index
    %c0_23 = arith.constant 0 : index
    %c0_24 = arith.constant 0 : index
    %23 = vector.load %arg3[%c0_22, %c0_23, %c0_24] : memref<4x3x128xf32, #tpu.memory_space<vmem>>, vector<1x3x128xf32>
    %24 = vector.shape_cast %23 : vector<1x3x128xf32> to vector<3x128xf32>
    %25 = vector.shape_cast %22 : vector<3x128xf32> to vector<1x3x128xf32>
    tpu.vector_store %arg3[%c0_22, %c0_23, %c0_24], %25 {strides = array<i32>} : memref<4x3x128xf32, #tpu.memory_space<vmem>>, vector<1x3x128xf32>,
    %c4_25 = arith.constant 4 : index
    %c0_26 = arith.constant 0 : index
    %c0_27 = arith.constant 0 : index
    %26 = vector.load %arg2[%c4_25, %c0_26, %c0_27] : memref<16x3x4xbf16, #tpu.memory_space<vmem>>, vector<1x3x4xbf16>
    %27 = vector.shape_cast %26 : vector<1x3x4xbf16> to vector<3x4xbf16>
    %c1_28 = arith.constant 1 : index
    %c0_29 = arith.constant 0 : index
    %c0_30 = arith.constant 0 : index
    %28 = vector.load %arg1[%c1_28, %c0_29, %c0_30] : memref<9x4x128xbf16, #tpu.memory_space<vmem>>, vector<1x4x128xbf16>
    %29 = vector.shape_cast %28 : vector<1x4x128xbf16> to vector<4x128xbf16>
    %cst_31 = arith.constant dense<0.000000e+00> : vector<3x128xf32>
    %30 = tpu.matmul %27, %29, %cst_31 {dimension_numbers = #tpu.dot_dimension_numbers<[1], [0], [0], [1], [0, 0, 1, 1], [], []>} : vector<3x4xbf16>, vector<4x128xbf16>, vector<3x128xf32> -> vector<3x128xf32>
    %c5 = arith.constant 5 : index
    %c0_32 = arith.constant 0 : index
    %c0_33 = arith.constant 0 : index
    %31 = vector.load %arg2[%c5, %c0_32, %c0_33] : memref<16x3x4xbf16, #tpu.memory_space<vmem>>, vector<1x3x4xbf16>
    %32 = vector.shape_cast %31 : vector<1x3x4xbf16> to vector<3x4xbf16>
    %c2_34 = arith.constant 2 : index
    %c0_35 = arith.constant 0 : index
    %c0_36 = arith.constant 0 : index
    %33 = vector.load %arg1[%c2_34, %c0_35, %c0_36] : memref<9x4x128xbf16, #tpu.memory_space<vmem>>, vector<1x4x128xbf16>
    %34 = vector.shape_cast %33 : vector<1x4x128xbf16> to vector<4x128xbf16>
    %cst_37 = arith.constant dense<0.000000e+00> : vector<3x128xf32>
    %35 = tpu.matmul %32, %34, %cst_37 {dimension_numbers = #tpu.dot_dimension_numbers<[1], [0], [0], [1], [0, 0, 1, 1], [], []>} : vector<3x4xbf16>, vector<4x128xbf16>, vector<3x128xf32> -> vector<3x128xf32>
    %36 = arith.addf %30, %35 : vector<3x128xf32>
    %c6 = arith.constant 6 : index
    %c0_38 = arith.constant 0 : index
    %c0_39 = arith.constant 0 : index
    %37 = vector.load %arg2[%c6, %c0_38, %c0_39] : memref<16x3x4xbf16, #tpu.memory_space<vmem>>, vector<1x3x4xbf16>
    %38 = vector.shape_cast %37 : vector<1x3x4xbf16> to vector<3x4xbf16>
    %c4_40 = arith.constant 4 : index
    %c0_41 = arith.constant 0 : index
    %c0_42 = arith.constant 0 : index
    %39 = vector.load %arg1[%c4_40, %c0_41, %c0_42] : memref<9x4x128xbf16, #tpu.memory_space<vmem>>, vector<1x4x128xbf16>
    %40 = vector.shape_cast %39 : vector<1x4x128xbf16> to vector<4x128xbf16>
    %cst_43 = arith.constant dense<0.000000e+00> : vector<3x128xf32>
    %41 = tpu.matmul %38, %40, %cst_43 {dimension_numbers = #tpu.dot_dimension_numbers<[1], [0], [0], [1], [0, 0, 1, 1], [], []>} : vector<3x4xbf16>, vector<4x128xbf16>, vector<3x128xf32> -> vector<3x128xf32>
    %42 = arith.addf %36, %41 : vector<3x128xf32>
    %c7 = arith.constant 7 : index
    %c0_44 = arith.constant 0 : index
    %c0_45 = arith.constant 0 : index
    %43 = vector.load %arg2[%c7, %c0_44, %c0_45] : memref<16x3x4xbf16, #tpu.memory_space<vmem>>, vector<1x3x4xbf16>
    %44 = vector.shape_cast %43 : vector<1x3x4xbf16> to vector<3x4xbf16>
    %c5_46 = arith.constant 5 : index
    %c0_47 = arith.constant 0 : index
    %c0_48 = arith.constant 0 : index
    %45 = vector.load %arg1[%c5_46, %c0_47, %c0_48] : memref<9x4x128xbf16, #tpu.memory_space<vmem>>, vector<1x4x128xbf16>
    %46 = vector.shape_cast %45 : vector<1x4x128xbf16> to vector<4x128xbf16>
    %cst_49 = arith.constant dense<0.000000e+00> : vector<3x128xf32>
    %47 = tpu.matmul %44, %46, %cst_49 {dimension_numbers = #tpu.dot_dimension_numbers<[1], [0], [0], [1], [0, 0, 1, 1], [], []>} : vector<3x4xbf16>, vector<4x128xbf16>, vector<3x128xf32> -> vector<3x128xf32>
    %48 = arith.addf %42, %47 : vector<3x128xf32>
    %c1_50 = arith.constant 1 : index
    %c0_51 = arith.constant 0 : index
    %c0_52 = arith.constant 0 : index
    %49 = vector.load %arg3[%c1_50, %c0_51, %c0_52] : memref<4x3x128xf32, #tpu.memory_space<vmem>>, vector<1x3x128xf32>
    %50 = vector.shape_cast %49 : vector<1x3x128xf32> to vector<3x128xf32>
    %51 = vector.shape_cast %48 : vector<3x128xf32> to vector<1x3x128xf32>
    tpu.vector_store %arg3[%c1_50, %c0_51, %c0_52], %51 {strides = array<i32>} : memref<4x3x128xf32, #tpu.memory_space<vmem>>, vector<1x3x128xf32>,
    %c8 = arith.constant 8 : index
    %c0_53 = arith.constant 0 : index
    %c0_54 = arith.constant 0 : index
    %52 = vector.load %arg2[%c8, %c0_53, %c0_54] : memref<16x3x4xbf16, #tpu.memory_space<vmem>>, vector<1x3x4xbf16>
    %53 = vector.shape_cast %52 : vector<1x3x4xbf16> to vector<3x4xbf16>
    %c3_55 = arith.constant 3 : index
    %c0_56 = arith.constant 0 : index
    %c0_57 = arith.constant 0 : index
    %54 = vector.load %arg1[%c3_55, %c0_56, %c0_57] : memref<9x4x128xbf16, #tpu.memory_space<vmem>>, vector<1x4x128xbf16>
    %55 = vector.shape_cast %54 : vector<1x4x128xbf16> to vector<4x128xbf16>
    %cst_58 = arith.constant dense<0.000000e+00> : vector<3x128xf32>
    %56 = tpu.matmul %53, %55, %cst_58 {dimension_numbers = #tpu.dot_dimension_numbers<[1], [0], [0], [1], [0, 0, 1, 1], [], []>} : vector<3x4xbf16>, vector<4x128xbf16>, vector<3x128xf32> -> vector<3x128xf32>
    %c9 = arith.constant 9 : index
    %c0_59 = arith.constant 0 : index
    %c0_60 = arith.constant 0 : index
    %57 = vector.load %arg2[%c9, %c0_59, %c0_60] : memref<16x3x4xbf16, #tpu.memory_space<vmem>>, vector<1x3x4xbf16>
    %58 = vector.shape_cast %57 : vector<1x3x4xbf16> to vector<3x4xbf16>
    %c4_61 = arith.constant 4 : index
    %c0_62 = arith.constant 0 : index
    %c0_63 = arith.constant 0 : index
    %59 = vector.load %arg1[%c4_61, %c0_62, %c0_63] : memref<9x4x128xbf16, #tpu.memory_space<vmem>>, vector<1x4x128xbf16>
    %60 = vector.shape_cast %59 : vector<1x4x128xbf16> to vector<4x128xbf16>
    %cst_64 = arith.constant dense<0.000000e+00> : vector<3x128xf32>
    %61 = tpu.matmul %58, %60, %cst_64 {dimension_numbers = #tpu.dot_dimension_numbers<[1], [0], [0], [1], [0, 0, 1, 1], [], []>} : vector<3x4xbf16>, vector<4x128xbf16>, vector<3x128xf32> -> vector<3x128xf32>
    %62 = arith.addf %56, %61 : vector<3x128xf32>
    %c10 = arith.constant 10 : index
    %c0_65 = arith.constant 0 : index
    %c0_66 = arith.constant 0 : index
    %63 = vector.load %arg2[%c10, %c0_65, %c0_66] : memref<16x3x4xbf16, #tpu.memory_space<vmem>>, vector<1x3x4xbf16>
    %64 = vector.shape_cast %63 : vector<1x3x4xbf16> to vector<3x4xbf16>
    %c6_67 = arith.constant 6 : index
    %c0_68 = arith.constant 0 : index
    %c0_69 = arith.constant 0 : index
    %65 = vector.load %arg1[%c6_67, %c0_68, %c0_69] : memref<9x4x128xbf16, #tpu.memory_space<vmem>>, vector<1x4x128xbf16>
    %66 = vector.shape_cast %65 : vector<1x4x128xbf16> to vector<4x128xbf16>
    %cst_70 = arith.constant dense<0.000000e+00> : vector<3x128xf32>
    %67 = tpu.matmul %64, %66, %cst_70 {dimension_numbers = #tpu.dot_dimension_numbers<[1], [0], [0], [1], [0, 0, 1, 1], [], []>} : vector<3x4xbf16>, vector<4x128xbf16>, vector<3x128xf32> -> vector<3x128xf32>
    %68 = arith.addf %62, %67 : vector<3x128xf32>
    %c11 = arith.constant 11 : index
    %c0_71 = arith.constant 0 : index
    %c0_72 = arith.constant 0 : index
    %69 = vector.load %arg2[%c11, %c0_71, %c0_72] : memref<16x3x4xbf16, #tpu.memory_space<vmem>>, vector<1x3x4xbf16>
    %70 = vector.shape_cast %69 : vector<1x3x4xbf16> to vector<3x4xbf16>
    %c7_73 = arith.constant 7 : index
    %c0_74 = arith.constant 0 : index
    %c0_75 = arith.constant 0 : index
    %71 = vector.load %arg1[%c7_73, %c0_74, %c0_75] : memref<9x4x128xbf16, #tpu.memory_space<vmem>>, vector<1x4x128xbf16>
    %72 = vector.shape_cast %71 : vector<1x4x128xbf16> to vector<4x128xbf16>
    %cst_76 = arith.constant dense<0.000000e+00> : vector<3x128xf32>
    %73 = tpu.matmul %70, %72, %cst_76 {dimension_numbers = #tpu.dot_dimension_numbers<[1], [0], [0], [1], [0, 0, 1, 1], [], []>} : vector<3x4xbf16>, vector<4x128xbf16>, vector<3x128xf32> -> vector<3x128xf32>
    %74 = arith.addf %68, %73 : vector<3x128xf32>
    %c2_77 = arith.constant 2 : index
    %c0_78 = arith.constant 0 : index
    %c0_79 = arith.constant 0 : index
    %75 = vector.load %arg3[%c2_77, %c0_78, %c0_79] : memref<4x3x128xf32, #tpu.memory_space<vmem>>, vector<1x3x128xf32>
    %76 = vector.shape_cast %75 : vector<1x3x128xf32> to vector<3x128xf32>
    %77 = vector.shape_cast %74 : vector<3x128xf32> to vector<1x3x128xf32>
    tpu.vector_store %arg3[%c2_77, %c0_78, %c0_79], %77 {strides = array<i32>} : memref<4x3x128xf32, #tpu.memory_space<vmem>>, vector<1x3x128xf32>,
    %c12 = arith.constant 12 : index
    %c0_80 = arith.constant 0 : index
    %c0_81 = arith.constant 0 : index
    %78 = vector.load %arg2[%c12, %c0_80, %c0_81] : memref<16x3x4xbf16, #tpu.memory_space<vmem>>, vector<1x3x4xbf16>
    %79 = vector.shape_cast %78 : vector<1x3x4xbf16> to vector<3x4xbf16>
    %c4_82 = arith.constant 4 : index
    %c0_83 = arith.constant 0 : index
    %c0_84 = arith.constant 0 : index
    %80 = vector.load %arg1[%c4_82, %c0_83, %c0_84] : memref<9x4x128xbf16, #tpu.memory_space<vmem>>, vector<1x4x128xbf16>
    %81 = vector.shape_cast %80 : vector<1x4x128xbf16> to vector<4x128xbf16>
    %cst_85 = arith.constant dense<0.000000e+00> : vector<3x128xf32>
    %82 = tpu.matmul %79, %81, %cst_85 {dimension_numbers = #tpu.dot_dimension_numbers<[1], [0], [0], [1], [0, 0, 1, 1], [], []>} : vector<3x4xbf16>, vector<4x128xbf16>, vector<3x128xf32> -> vector<3x128xf32>
    %c13 = arith.constant 13 : index
    %c0_86 = arith.constant 0 : index
    %c0_87 = arith.constant 0 : index
    %83 = vector.load %arg2[%c13, %c0_86, %c0_87] : memref<16x3x4xbf16, #tpu.memory_space<vmem>>, vector<1x3x4xbf16>
    %84 = vector.shape_cast %83 : vector<1x3x4xbf16> to vector<3x4xbf16>
    %c5_88 = arith.constant 5 : index
    %c0_89 = arith.constant 0 : index
    %c0_90 = arith.constant 0 : index
    %85 = vector.load %arg1[%c5_88, %c0_89, %c0_90] : memref<9x4x128xbf16, #tpu.memory_space<vmem>>, vector<1x4x128xbf16>
    %86 = vector.shape_cast %85 : vector<1x4x128xbf16> to vector<4x128xbf16>
    %cst_91 = arith.constant dense<0.000000e+00> : vector<3x128xf32>
    %87 = tpu.matmul %84, %86, %cst_91 {dimension_numbers = #tpu.dot_dimension_numbers<[1], [0], [0], [1], [0, 0, 1, 1], [], []>} : vector<3x4xbf16>, vector<4x128xbf16>, vector<3x128xf32> -> vector<3x128xf32>
    %88 = arith.addf %82, %87 : vector<3x128xf32>
    %c14 = arith.constant 14 : index
    %c0_92 = arith.constant 0 : index
    %c0_93 = arith.constant 0 : index
    %89 = vector.load %arg2[%c14, %c0_92, %c0_93] : memref<16x3x4xbf16, #tpu.memory_space<vmem>>, vector<1x3x4xbf16>
    %90 = vector.shape_cast %89 : vector<1x3x4xbf16> to vector<3x4xbf16>
    %c7_94 = arith.constant 7 : index
    %c0_95 = arith.constant 0 : index
    %c0_96 = arith.constant 0 : index
    %91 = vector.load %arg1[%c7_94, %c0_95, %c0_96] : memref<9x4x128xbf16, #tpu.memory_space<vmem>>, vector<1x4x128xbf16>
    %92 = vector.shape_cast %91 : vector<1x4x128xbf16> to vector<4x128xbf16>
    %cst_97 = arith.constant dense<0.000000e+00> : vector<3x128xf32>
    %93 = tpu.matmul %90, %92, %cst_97 {dimension_numbers = #tpu.dot_dimension_numbers<[1], [0], [0], [1], [0, 0, 1, 1], [], []>} : vector<3x4xbf16>, vector<4x128xbf16>, vector<3x128xf32> -> vector<3x128xf32>
    %94 = arith.addf %88, %93 : vector<3x128xf32>
    %c15 = arith.constant 15 : index
    %c0_98 = arith.constant 0 : index
    %c0_99 = arith.constant 0 : index
    %95 = vector.load %arg2[%c15, %c0_98, %c0_99] : memref<16x3x4xbf16, #tpu.memory_space<vmem>>, vector<1x3x4xbf16>
    %96 = vector.shape_cast %95 : vector<1x3x4xbf16> to vector<3x4xbf16>
    %c8_100 = arith.constant 8 : index
    %c0_101 = arith.constant 0 : index
    %c0_102 = arith.constant 0 : index
    %97 = vector.load %arg1[%c8_100, %c0_101, %c0_102] : memref<9x4x128xbf16, #tpu.memory_space<vmem>>, vector<1x4x128xbf16>
    %98 = vector.shape_cast %97 : vector<1x4x128xbf16> to vector<4x128xbf16>
    %cst_103 = arith.constant dense<0.000000e+00> : vector<3x128xf32>
    %99 = tpu.matmul %96, %98, %cst_103 {dimension_numbers = #tpu.dot_dimension_numbers<[1], [0], [0], [1], [0, 0, 1, 1], [], []>} : vector<3x4xbf16>, vector<4x128xbf16>, vector<3x128xf32> -> vector<3x128xf32>
    %100 = arith.addf %94, %99 : vector<3x128xf32>
    %c3_104 = arith.constant 3 : index
    %c0_105 = arith.constant 0 : index
    %c0_106 = arith.constant 0 : index
    %101 = vector.load %arg3[%c3_104, %c0_105, %c0_106] : memref<4x3x128xf32, #tpu.memory_space<vmem>>, vector<1x3x128xf32>
    %102 = vector.shape_cast %101 : vector<1x3x128xf32> to vector<3x128xf32>
    %103 = vector.shape_cast %100 : vector<3x128xf32> to vector<1x3x128xf32>
    tpu.vector_store %arg3[%c3_104, %c0_105, %c0_106], %103 {strides = array<i32>} : memref<4x3x128xf32, #tpu.memory_space<vmem>>, vector<1x3x128xf32>,
    return
  }
  func.func @transform_0(%arg0: i32) -> (i32, i32, i32) {
    %c0_i32 = arith.constant 0 : i32
    %c0_i32_0 = arith.constant 0 : i32
    %c0_i32_1 = arith.constant 0 : i32
    %c0_i32_2 = arith.constant 0 : i32
    return %c0_i32, %c0_i32_0, %c0_i32_1 : i32, i32, i32
  }
  func.func @transform_1(%arg0: i32) -> (i32, i32, i32) {
    %c0_i32 = arith.constant 0 : i32
    %c0_i32_0 = arith.constant 0 : i32
    %c0_i32_1 = arith.constant 0 : i32
    %c0_i32_2 = arith.constant 0 : i32
    return %c0_i32, %c0_i32_0, %c0_i32_1 : i32, i32, i32
  }
  func.func @transform_2(%arg0: i32) -> (i32, i32, i32) {
    %c0_i32 = arith.constant 0 : i32
    %c0_i32_0 = arith.constant 0 : i32
    %c0_i32_1 = arith.constant 0 : i32
    %c0_i32_2 = arith.constant 0 : i32
    return %c0_i32, %c0_i32_0, %c0_i32_1 : i32, i32, i32
  }
}

</mosaic_0001>

<bundles_post_ra>
// kernel: dc_decoder_forward.3
= control target key start
LH: loop header
LB: loop body
LE: loop exit
PB: predicated region body
PF: predicated region fallthrough
CT: control target
= control target key end

     0   :  { %v179_v0 = vmov 0.0   ;;  %vm180_vm0 = vmmov 0   ;;  %vm35_vm1 = vcmask 261120   ;;  %v79_v4 = vlaneseq  ;;  %s231_s1 = inlined_call_operand.vmem [shape: bf16[32,128], index: 1, kind: input, shape index: {}]   ;;  %s232_s0 = inlined_call_operand.vmem [shape: bf16[2,32], index: 0, kind: input, shape index: {}]   ;;  %s233_s2 = inlined_call_operand.vmem [shape: f32[8,1], index: 2, kind: input, shape index: {}]   ;;  %s234_s3 = inlined_call_operand.vmem [shape: f32[8,1], index: 3, kind: input, shape index: {}]   ;;  %s235_s4 = inlined_call_operand.vmem [shape: bf16[2,128], index: 4, kind: output, shape index: {}]  }
   0x1   :  { %162 = vmatprep.subr.bf16.mxu0 %v179_v0  ;;  %v175_v1 = vld [vmem:[%s231_s1] sm:$0xff]   ;;  %166 = vmatprep.mubr.msk.bf16.mxu0 %vm180_vm0, %v179_v0  ;;  %v176_v2 = vld [vmem:[%s231_s1 + $0x8] sm:$0xff]   ;;  %vm89_vm2 = vcmask 1041408   ;;  %v181_v31 = vmov 0  }
   0x2   :  { %163 = vmatpush3.bf16.msra.mxu0 %v175_v1  ;;  %v18_v3 = vld [vmem:[%s232_s0] sm:$0x1]  ;;  %v82_v5 = vshrl.u32 %v79_v4, 7  ;;  %v80_v11 = vand.u32 127, %v79_v4  ;;  %173 = vset.pattern.permute.xlu1 %v181_v31 }
   0x3   :  { %164 = vmatprep.subr.bf16.mxu0 %v179_v0  ;;  %174 = vset.pattern.permute.xlu0 %v181_v31  ;;  %v118_v40 = vld [vmem:[%s233_s2] sm:$0xff] }
   0x4   :  { %v83_v6 = vmul.u32 16, %v82_v5  ;;  %v120_v43 = vld [vmem:[%s234_s3] sm:$0xff] }
   0x6   :  { %165 = vmatpush3.bf16.msra.mxu0 %v176_v2  ;;  %v85_v12 = vadd.s32 16, %v83_v6  ;;  %vm84_vm3 = vcmp.ge.s32.totalorder %v80_v11, %v83_v6 }
   0x8   :  { %vm86_vm4 = vcmp.lt.s32.totalorder %v80_v11, %v85_v12 }
   0x9   :  { %167 = vmatmul.mubr.msk.bf16.vlgmr.msra.gmra.mrb[0].mxu0 %vm35_vm1, %v18_v3  ;;  %vm87_vm5 = vmand %vm84_vm3, %vm86_vm4 }
   0xa   :  { %v88_v25 = vsel %vm87_vm5, 1.0, %v179_v0 }
  0xdc   :  { %v216_v7 = vpop.f32.mrb[0].mxu0 }
  0xdd   :  { %v90_v8 = vsel %vm89_vm2, %v216_v7, 0.0  ;;  %v97_v9 = vmul.f32 %v216_v7, %v216_v7  ;;  %v168_v10 = vpop.f32.mrb[1].mxu0 }
  0xde   :  { %v91_v13 = vrot.slane %v90_v8, 4  ;;  %v76_v14 = vpop.f32.mrb[2].mxu0 }
  0xdf   :  { %v98_v15 = vsel %vm89_vm2, %v97_v9, 0.0  ;;  %v169_v16 = vpop.f32.mrb[3].mxu0 }
  0xe0   :  { %v92_v17 = vadd.f32 %v91_v13, %v90_v8  ;;  %v99_v18 = vrot.slane %v98_v15, 4 }
  0xe2   :  { %v100_v19 = vadd.f32 %v99_v18, %v98_v15  ;;  %v93_v20 = vrot.slane %v92_v17, 2 }
  0xe4   :  { %v94_v21 = vadd.f32 %v93_v20, %v92_v17  ;;  %v101_v22 = vrot.slane %v100_v19, 2 }
  0xe6   :  { %v95_v23 = vrot.slane %v94_v21, 1  ;;  %v102_v24 = vadd.f32 %v101_v22, %v100_v19 }
  0xe8   :  { %v96_v26 = vadd.f32 %v95_v23, %v94_v21  ;;  %v103_v27 = vrot.slane %v102_v24, 1 }
  0xea   :  { %v105_v28 = vmul.f32 %v96_v26, %v88_v25  ;;  %v104_v29 = vadd.f32 %v103_v27, %v102_v24 }
  0xec   :  { %106 = vadd.xlane.f32.xlu0 %v105_v28  ;;  %v109_v30 = vmul.f32 %v104_v29, %v88_v25 }
  0xf0   :  { %110 = vadd.xlane.f32.xlu0 %v109_v30 }
 0x179   :  { %v107_v32 = vpop.xlane.xlu0 %106 }
 0x17a   :  { %v108_v33 = vmul.f32 0.03125, %v107_v32 }
 0x17c   :  { %v113_v35 = vmul.f32 %v108_v33, %v108_v33 }
 0x17d   :  { %v111_v34 = vpop.xlane.xlu0 %110 }
 0x17e   :  { %v112_v36 = vmul.f32 0.03125, %v111_v34 }
 0x180   :  { %v114_v37 = vsub.f32 %v112_v36, %v113_v35 }
 0x182   :  { %v115_v38 = vmax.f32 %v114_v37, 0.0 }
 0x184   :  { %v116_v39 = vadd.f32 1e-05, %v115_v38 }
 0x186   :  { %177 = vrsqrt.f32 %v116_v39 }
 0x190   :  { %v178_v41 = vpop.eup %177 }
 0x191   :  { %v119_v42 = vmul.f32 %v178_v41, %v118_v40 }
 0x193   :  { %125 = vperm.xlu1 %173, %v119_v42   ;;  %v121_v44 = vmul.f32 %v119_v42, %v108_v33 }
 0x195   :  { %v122_v45 = vsub.f32 %v120_v43, %v121_v44 }
 0x197   :  { %137 = vperm.xlu1 %173, %v122_v45  }
 0x212   :  { %v126_v46 = vpop.permute.xlu1 %125 }
 0x213   :  { %v128_v47 = vmul.f32 %v126_v46, %v88_v25 }
 0x215   :  { %v129_v48 = vrot.slane %v128_v47, 4 }
 0x216   :  { %v138_v49 = vpop.permute.xlu1 %137 }
 0x217   :  { %v130_v50 = vadd.f32 %v129_v48, %v128_v47  ;;  %v140_v51 = vmul.f32 %v138_v49, %v88_v25 }
 0x219   :  { %v131_v52 = vrot.slane %v130_v50, 2  ;;  %v141_v53 = vrot.slane %v140_v51, 4 }
 0x21b   :  { %v132_v54 = vadd.f32 %v131_v52, %v130_v50  ;;  %v142_v55 = vadd.f32 %v141_v53, %v140_v51 }
 0x21d   :  { %v133_v56 = vrot.slane %v132_v54, 1  ;;  %v143_v57 = vrot.slane %v142_v55, 2 }
 0x21f   :  { %v134_v58 = vadd.f32 %v133_v56, %v132_v54  ;;  %v144_v59 = vadd.f32 %v143_v57, %v142_v55 }
 0x221   :  { %v145_v60 = vrot.slane %v144_v59, 1  ;;  %v147_v61 = vmul.f32 %v134_v58, %v216_v7 }
 0x223   :  { %v146_v62 = vadd.f32 %v145_v60, %v144_v59 }
 0x225   :  { %v148_v63 = vadd.f32 %v147_v61, %v146_v62 }
 0x227   :  { %v149_v0 = vmax.f32 %v148_v63, 0.0 }
 0x229   :  { %v150_v1 = vpack.c.bf16 %v149_v0, %v149_v0 }
 0x22b   :  { %151 = vst [vmem:[%s235_s4] sm:$0x1] %v150_v1 }

// kernel: dc_decoder_forward.4
= control target key start
LH: loop header
LB: loop body
LE: loop exit
PB: predicated region body
PF: predicated region fallthrough
CT: control target
= control target key end

     0   :  { %vm28_vm0 = vcmask 1043456   ;;  %v1149_v0 = vmov 0.0   ;;  %vm1150_vm1 = vmmov 0   ;;  %vm24_vm2 = vcmask 64512   ;;  %s1389_s0 = inlined_call_operand.vmem [shape: bf16[9,8,32], index: 0, kind: input, shape index: {}]   ;;  %s1390_s1 = inlined_call_operand.vmem [shape: bf16[16,4,8], index: 1, kind: input, shape index: {}]   ;;  %s1391_s2 = inlined_call_operand.vmem [shape: f32[4,1], index: 2, kind: input, shape index: {}]   ;;  %s1392_s3 = inlined_call_operand.vmem [shape: f32[4,1], index: 3, kind: input, shape index: {}]   ;;  %s1393_s4 = inlined_call_operand.vmem [shape: bf16[4,4,32], index: 4, kind: output, shape index: {}]  }
   0x1   :  { %998 = vmatprep.subr.bf16.mxu0 %v1149_v0  ;;  %1022 = vmatprep.subr.bf16.mxu1 %v1149_v0  ;;  %v918_v1 = vld [vmem:[%s1389_s0 + $0x4] sm:$0xf]  ;;  %v930_v2 = vld [vmem:[%s1389_s0 + $0x8] sm:$0xf]  ;;  %v19_v5 = vld [vmem:[%s1389_s0] sm:$0xf] }
   0x2   :  { %v30_v3 = vsel %vm28_vm0, %v918_v1, 0  ;;  %v242_v4 = vsel %vm28_vm0, %v930_v2, 0  ;;  %1000 = vmatprep.mubr.msk.bf16.mxu0 %vm1150_vm1, %v1149_v0  ;;  %1024 = vmatprep.mubr.msk.bf16.mxu1 %vm1150_vm1, %v1149_v0  ;;  %v917_v6 = vld [vmem:[%s1390_s1 + $0x2] sm:$0x3]  ;;  %v929_v7 = vld [vmem:[%s1390_s1 + $0xa] sm:$0x3] }
   0x3   :  { %999 = vmatpush3.bf16.msra.mxu0 %v30_v3  ;;  %1023 = vmatpush3.bf16.msra.mxu1 %v242_v4  ;;  %v928_v8 = vld [vmem:[%s1389_s0 + $0x4] sm:$0xf]  ;;  %v76_v9 = vsel %vm28_vm0, %v19_v5, 0  ;;  %v922_v11 = vld [vmem:[%s1389_s0 + $0xc] sm:$0xf]  ;;  %vm220_vm3 = vcmask 257024  }
   0x4   :  { %1004 = vmatprep.subr.bf16.mxu0 %v1149_v0  ;;  %1028 = vmatprep.subr.bf16.mxu1 %v1149_v0  ;;  %v288_v10 = vsel %vm28_vm0, %v928_v8, 0  ;;  %v934_v12 = vld [vmem:[%s1389_s0 + $0x10] sm:$0xf]  ;;  %v18_v13 = vld [vmem:[%s1390_s1] sm:$0x3]  ;;  %v126_v18 = vsel %vm28_vm0, %v922_v11, 0 }
   0x5   :  { %v949_v14 = vld [vmem:[%s1389_s0 + $0x1c] sm:$0xf]  ;;  %v927_v15 = vld [vmem:[%s1390_s1 + $0x8] sm:$0x3]  ;;  %v961_v17 = vld [vmem:[%s1389_s0 + $0x20] sm:$0xf] }
   0x6   :  { %1001 = vmatmul.mubr.msk.bf16.vlgmr.msra.gmra.mrb[0].mxu0 %vm24_vm2, %v917_v6  ;;  %1025 = vmatmul.mubr.msk.bf16.vlgmr.msra.gmra.mrb[0].mxu1 %vm24_vm2, %v929_v7  ;;  %v1231_v16 = vsel %vm28_vm0, %v949_v14, 0  ;;  %v337_v19 = vsel %vm28_vm0, %v934_v12, 0  ;;  %v1239_v20 = vsel %vm28_vm0, %v961_v17, 0  ;;  %v925_v21 = vld [vmem:[%s1389_s0 + $0x10] sm:$0xf]  ;;  %vm890_vm4 = vcmask 254976  }
   0x7   :  { %1005 = vmatpush3.bf16.msra.mxu0 %v76_v9  ;;  %1029 = vmatpush3.bf16.msra.mxu1 %v288_v10  ;;  %v937_v22 = vld [vmem:[%s1389_s0 + $0x14] sm:$0xf]  ;;  %v921_v23 = vld [vmem:[%s1390_s1 + $0x4] sm:$0x3]  ;;  %v933_v24 = vld [vmem:[%s1390_s1 + $0xc] sm:$0x3] }
   0x8   :  { %1006 = vmatprep.mubr.msk.bf16.mxu0 %vm1150_vm1, %v1149_v0  ;;  %1030 = vmatprep.mubr.msk.bf16.mxu1 %vm1150_vm1, %v1149_v0  ;;  %v177_v25 = vsel %vm28_vm0, %v925_v21, 0  ;;  %v388_v26 = vsel %vm28_vm0, %v937_v22, 0  ;;  %v942_v27 = vld [vmem:[%s1389_s0 + $0x10] sm:$0xf]  ;;  %v954_v28 = vld [vmem:[%s1389_s0 + $0x14] sm:$0xf] }
   0x9   :  { %1010 = vmatprep.subr.bf16.mxu0 %v1149_v0  ;;  %1034 = vmatprep.subr.bf16.mxu1 %v1149_v0  ;;  %v924_v29 = vld [vmem:[%s1390_s1 + $0x6] sm:$0x3]  ;;  %v936_v30 = vld [vmem:[%s1390_s1 + $0xe] sm:$0x3]  ;;  %v452_v31 = vsel %vm28_vm0, %v942_v27, 0  ;;  %v663_v32 = vsel %vm28_vm0, %v954_v28, 0 }
   0xa   :  { %v940_v33 = vld [vmem:[%s1389_s0 + $0xc] sm:$0xf]  ;;  %v952_v34 = vld [vmem:[%s1389_s0 + $0x10] sm:$0xf]  ;;  %v953_v36 = vld [vmem:[%s1390_s1 + $0x1a] sm:$0x3] }
   0xb   :  { %v941_v35 = vld [vmem:[%s1390_s1 + $0x12] sm:$0x3]  ;;  %v498_v37 = vsel %vm28_vm0, %v940_v33, 0  ;;  %v709_v38 = vsel %vm28_vm0, %v952_v34, 0  ;;  %v946_v39 = vld [vmem:[%s1389_s0 + $0x18] sm:$0xf] }
   0xc   :  { %v958_v40 = vld [vmem:[%s1389_s0 + $0x1c] sm:$0xf]  ;;  %v939_v41 = vld [vmem:[%s1390_s1 + $0x10] sm:$0x3]  ;;  %v951_v42 = vld [vmem:[%s1390_s1 + $0x18] sm:$0x3] }
   0xd   :  { %v548_v43 = vsel %vm28_vm0, %v946_v39, 0  ;;  %v758_v44 = vsel %vm28_vm0, %v958_v40, 0  ;;  %v945_v45 = vld [vmem:[%s1390_s1 + $0x14] sm:$0x3]  ;;  %v957_v46 = vld [vmem:[%s1390_s1 + $0x1c] sm:$0x3] }
   0xe   :  { %v948_v47 = vld [vmem:[%s1390_s1 + $0x16] sm:$0x3]  ;;  %v960_v48 = vld [vmem:[%s1390_s1 + $0x1e] sm:$0x3]  ;;  %v870_v34 = vld [vmem:[%s1391_s2] sm:$0xf] }
  0x12   :  { %1007 = vmatmul.mubr.msk.bf16.vlgmr.msra.gmra.mrb[0].mxu0 %vm24_vm2, %v18_v13  ;;  %1031 = vmatmul.mubr.msk.bf16.vlgmr.msra.gmra.mrb[0].mxu1 %vm24_vm2, %v927_v15  ;;  %v1151_v13 = vmov 0  }
  0x13   :  { %1011 = vmatpush3.bf16.msra.mxu0 %v126_v18  ;;  %1035 = vmatpush3.bf16.msra.mxu1 %v337_v19 }
  0x14   :  { %1012 = vmatprep.mubr.msk.bf16.mxu0 %vm1150_vm1, %v1149_v0  ;;  %1036 = vmatprep.mubr.msk.bf16.mxu1 %vm1150_vm1, %v1149_v0 }
  0x15   :  { %1016 = vmatprep.subr.bf16.mxu0 %v1149_v0  ;;  %1040 = vmatprep.subr.bf16.mxu1 %v1149_v0 }
  0x16   :  { %1145 = vset.pattern.permute.xlu0 %v1151_v13  ;;  %1146 = vset.pattern.permute.xlu1 %v1151_v13 }
  0x1e   :  { %1013 = vmatmul.mubr.msk.bf16.vlgmr.msra.gmra.mrb[0].mxu0 %vm24_vm2, %v921_v23  ;;  %1037 = vmatmul.mubr.msk.bf16.vlgmr.msra.gmra.mrb[0].mxu1 %vm24_vm2, %v933_v24 }
  0x1f   :  { %1017 = vmatpush3.bf16.msra.mxu0 %v177_v25  ;;  %1041 = vmatpush3.bf16.msra.mxu1 %v388_v26 }
  0x20   :  { %1018 = vmatprep.mubr.msk.bf16.mxu0 %vm1150_vm1, %v1149_v0  ;;  %1042 = vmatprep.mubr.msk.bf16.mxu1 %vm1150_vm1, %v1149_v0 }
  0x21   :  { %1046 = vmatprep.subr.bf16.mxu0 %v1149_v0  ;;  %1070 = vmatprep.subr.bf16.mxu1 %v1149_v0 }
  0x2a   :  { %1019 = vmatmul.mubr.msk.bf16.vlgmr.msra.gmra.mrb[0].mxu0 %vm24_vm2, %v924_v29  ;;  %1043 = vmatmul.mubr.msk.bf16.vlgmr.msra.gmra.mrb[0].mxu1 %vm24_vm2, %v936_v30 }
  0x2b   :  { %1047 = vmatpush3.bf16.msra.mxu0 %v452_v31  ;;  %1071 = vmatpush3.bf16.msra.mxu1 %v663_v32 }
  0x2c   :  { %1048 = vmatprep.mubr.msk.bf16.mxu0 %vm1150_vm1, %v1149_v0  ;;  %1072 = vmatprep.mubr.msk.bf16.mxu1 %vm1150_vm1, %v1149_v0 }
  0x2d   :  { %1052 = vmatprep.subr.bf16.mxu0 %v1149_v0  ;;  %1076 = vmatprep.subr.bf16.mxu1 %v1149_v0 }
  0x32   :  { %1049 = vmatmul.mubr.msk.bf16.vlgmr.msra.gmra.mrb[4].mxu0 %vm24_vm2, %v941_v35  ;;  %1073 = vmatmul.mubr.msk.bf16.vlgmr.msra.gmra.mrb[4].mxu1 %vm24_vm2, %v953_v36 }
  0x33   :  { %1053 = vmatpush3.bf16.msra.mxu0 %v498_v37  ;;  %1077 = vmatpush3.bf16.msra.mxu1 %v709_v38  ;;  %v872_v37 = vld [vmem:[%s1392_s3] sm:$0xf] }
  0x34   :  { %1054 = vmatprep.mubr.msk.bf16.mxu0 %vm1150_vm1, %v1149_v0  ;;  %1078 = vmatprep.mubr.msk.bf16.mxu1 %vm1150_vm1, %v1149_v0 }
  0x35   :  { %1058 = vmatprep.subr.bf16.mxu0 %v1149_v0  ;;  %1082 = vmatprep.subr.bf16.mxu1 %v1149_v0 }
  0x3e   :  { %1055 = vmatmul.mubr.msk.bf16.vlgmr.msra.gmra.mrb[4].mxu0 %vm24_vm2, %v939_v41  ;;  %1079 = vmatmul.mubr.msk.bf16.vlgmr.msra.gmra.mrb[4].mxu1 %vm24_vm2, %v951_v42 }
  0x3f   :  { %1059 = vmatpush3.bf16.msra.mxu0 %v548_v43  ;;  %1083 = vmatpush3.bf16.msra.mxu1 %v758_v44 }
  0x40   :  { %1060 = vmatprep.mubr.msk.bf16.mxu0 %vm1150_vm1, %v1149_v0  ;;  %1084 = vmatprep.mubr.msk.bf16.mxu1 %vm1150_vm1, %v1149_v0 }
  0x41   :  { %1064 = vmatprep.subr.bf16.mxu0 %v1149_v0  ;;  %1088 = vmatprep.subr.bf16.mxu1 %v1149_v0 }
  0x4a   :  { %1061 = vmatmul.mubr.msk.bf16.vlgmr.msra.gmra.mrb[4].mxu0 %vm24_vm2, %v945_v45  ;;  %1085 = vmatmul.mubr.msk.bf16.vlgmr.msra.gmra.mrb[4].mxu1 %vm24_vm2, %v957_v46 }
  0x4b   :  { %1065 = vmatpush3.bf16.msra.mxu0 %v1231_v16  ;;  %1089 = vmatpush3.bf16.msra.mxu1 %v1239_v20 }
  0x4c   :  { %1066 = vmatprep.mubr.msk.bf16.mxu0 %vm1150_vm1, %v1149_v0  ;;  %1090 = vmatprep.mubr.msk.bf16.mxu1 %vm1150_vm1, %v1149_v0 }
  0x56   :  { %1067 = vmatmul.mubr.msk.bf16.vlgmr.msra.gmra.mrb[4].mxu0 %vm24_vm2, %v948_v47  ;;  %1091 = vmatmul.mubr.msk.bf16.vlgmr.msra.gmra.mrb[4].mxu1 %vm24_vm2, %v960_v48 }
  0xfd   :  { %v213_v49 = vpop.f32.mrb[0].mxu0  ;;  %v424_v50 = vpop.f32.mrb[0].mxu1 }
  0xfe   :  { %221 = vst.msk [vmem:[#allocation2] sm:$0xf] %vm220_vm3, %v213_v49  ;;  %432 = vst.msk [vmem:[#allocation2 + $0x4] sm:$0xf] %vm220_vm3, %v424_v50  ;;  %v1020_v51 = vpop.f32.mrb[1].mxu0  ;;  %v1044_v52 = vpop.f32.mrb[1].mxu1  ;;  %v226_v54 = vmul.f32 %v213_v49, %v213_v49  ;;  %v437_v60 = vmul.f32 %v424_v50, %v424_v50 }
  0xff   :  { %v222_v53 = vsel %vm220_vm3, %v213_v49, 0.0  ;;  %v427_v55 = vpop.f32.mrb[2].mxu1  ;;  %v216_v56 = vpop.f32.mrb[2].mxu0  ;;  %v433_v61 = vsel %vm220_vm3, %v424_v50, 0.0 }
 0x100   :  { %223 = vadd.xlane.f32.xlu0 %v222_v53  ;;  %v1021_v57 = vpop.f32.mrb[3].mxu0  ;;  %v1045_v58 = vpop.f32.mrb[3].mxu1  ;;  %v227_v59 = vsel %vm220_vm3, %v226_v54, 0.0  ;;  %v438_v62 = vsel %vm220_vm3, %v437_v60, 0.0 }
 0x101   :  { %228 = vadd.xlane.f32.xlu1 %v227_v59 }
 0x104   :  { %434 = vadd.xlane.f32.xlu0 %v433_v61 }
 0x105   :  { %439 = vadd.xlane.f32.xlu1 %v438_v62  ;;  %v875_v41 = vld [vmem:[#allocation2] sm:$0xf]  ;;  %v892_v42 = vld [vmem:[#allocation2 + $0x4] sm:$0xf] }
 0x129   :  { %v635_v63 = vpop.f32.mrb[4].mxu0  ;;  %v845_v0 = vpop.f32.mrb[4].mxu1 }
 0x12a   :  { %643 = vst.msk [vmem:[#allocation2 + $0x8] sm:$0xf] %vm220_vm3, %v635_v63  ;;  %853 = vst.msk [vmem:[#allocation2 + $0xc] sm:$0xf] %vm220_vm3, %v845_v0  ;;  %v1068_v1 = vpop.f32.mrb[5].mxu0  ;;  %v1092_v2 = vpop.f32.mrb[5].mxu1  ;;  %v648_v4 = vmul.f32 %v635_v63, %v635_v63  ;;  %v858_v10 = vmul.f32 %v845_v0, %v845_v0 }
 0x12b   :  { %v644_v3 = vsel %vm220_vm3, %v635_v63, 0.0  ;;  %v848_v5 = vpop.f32.mrb[6].mxu1  ;;  %v638_v6 = vpop.f32.mrb[6].mxu0  ;;  %v854_v11 = vsel %vm220_vm3, %v845_v0, 0.0 }
 0x12c   :  { %645 = vadd.xlane.f32.xlu0 %v644_v3  ;;  %v1069_v7 = vpop.f32.mrb[7].mxu0  ;;  %v1093_v8 = vpop.f32.mrb[7].mxu1  ;;  %v649_v9 = vsel %vm220_vm3, %v648_v4, 0.0  ;;  %v859_v12 = vsel %vm220_vm3, %v858_v10, 0.0 }
 0x12d   :  { %650 = vadd.xlane.f32.xlu1 %v649_v9 }
 0x130   :  { %855 = vadd.xlane.f32.xlu0 %v854_v11 }
 0x131   :  { %860 = vadd.xlane.f32.xlu1 %v859_v12  ;;  %v906_v43 = vld [vmem:[#allocation2 + $0xc] sm:$0xf]  ;;  %v899_v44 = vld [vmem:[#allocation2 + $0x8] sm:$0xf] }
 0x18d   :  { %v224_v14 = vpop.xlane.xlu0 %223 }
 0x18e   :  { %v229_v15 = vpop.xlane.xlu1 %228 }
 0x191   :  { %v435_v16 = vpop.xlane.xlu0 %434 }
 0x192   :  { %v440_v17 = vpop.xlane.xlu1 %439  ;;  %v436_v19 = vadd.f32 %v435_v16, %v224_v14 }
 0x193   :  { %v441_v21 = vadd.f32 %v440_v17, %v229_v15 }
 0x1b9   :  { %v646_v18 = vpop.xlane.xlu0 %645 }
 0x1ba   :  { %v651_v20 = vpop.xlane.xlu1 %650  ;;  %v647_v22 = vadd.f32 %v646_v18, %v436_v19 }
 0x1bb   :  { %v652_v24 = vadd.f32 %v651_v20, %v441_v21 }
 0x1bd   :  { %v856_v23 = vpop.xlane.xlu0 %855 }
 0x1be   :  { %v857_v25 = vadd.f32 %v856_v23, %v647_v22  ;;  %v861_v26 = vpop.xlane.xlu1 %860 }
 0x1bf   :  { %v862_v28 = vadd.f32 %v861_v26, %v652_v24 }
 0x1c0   :  { %v863_v27 = vmul.f32 0.0078125, %v857_v25 }
 0x1c1   :  { %v864_v30 = vmul.f32 0.0078125, %v862_v28 }
 0x1c2   :  { %v865_v29 = vmul.f32 %v863_v27, %v863_v27 }
 0x1c4   :  { %v866_v31 = vsub.f32 %v864_v30, %v865_v29 }
 0x1c6   :  { %v867_v32 = vmax.f32 %v866_v31, 0.0 }
 0x1c8   :  { %v868_v33 = vadd.f32 1e-05, %v867_v32 }
 0x1ca   :  { %1147 = vrsqrt.f32 %v868_v33 }
 0x1d4   :  { %v1148_v35 = vpop.eup %1147 }
 0x1d5   :  { %v871_v36 = vmul.f32 %v1148_v35, %v870_v34 }
 0x1d7   :  { %878 = vperm.xlu0 %1145, %v871_v36   ;;  %v873_v38 = vmul.f32 %v871_v36, %v863_v27 }
 0x1d9   :  { %v874_v39 = vsub.f32 %v872_v37, %v873_v38 }
 0x1db   :  { %884 = vperm.xlu1 %1146, %v874_v39  }
 0x256   :  { %v879_v40 = vpop.permute.xlu0 %878 }
 0x257   :  { %v881_v45 = vmul.f32 %v879_v40, %v875_v41  ;;  %v893_v46 = vmul.f32 %v892_v42, %v879_v40  ;;  %v900_v47 = vmul.f32 %v899_v44, %v879_v40  ;;  %v907_v48 = vmul.f32 %v906_v43, %v879_v40 }
 0x25a   :  { %v885_v49 = vpop.permute.xlu1 %884 }
 0x25b   :  { %v887_v50 = vadd.f32 %v885_v49, %v881_v45  ;;  %v894_v51 = vadd.f32 %v893_v46, %v885_v49  ;;  %v901_v52 = vadd.f32 %v900_v47, %v885_v49  ;;  %v908_v53 = vadd.f32 %v907_v48, %v885_v49 }
 0x25d   :  { %v888_v54 = vmax.f32 %v887_v50, 0.0  ;;  %v895_v55 = vmax.f32 %v894_v51, 0.0  ;;  %v902_v56 = vmax.f32 %v901_v52, 0.0  ;;  %v909_v57 = vmax.f32 %v908_v53, 0.0 }
 0x25f   :  { %v889_v58 = vpack.c.bf16 %v888_v54, %v888_v54  ;;  %v896_v59 = vpack.c.bf16 %v895_v55, %v895_v55  ;;  %v903_v60 = vpack.c.bf16 %v902_v56, %v902_v56  ;;  %v910_v61 = vpack.c.bf16 %v909_v57, %v909_v57 }
 0x261   :  { %891 = vst.msk [vmem:[%s1393_s4] sm:$0x3] %vm890_vm4, %v889_v58  ;;  %963 = vst.msk [vmem:[%s1393_s4 + $0x2] sm:$0x3] %vm890_vm4, %v896_v59 }
 0x262   :  { %964 = vst.msk [vmem:[%s1393_s4 + $0x4] sm:$0x3] %vm890_vm4, %v903_v60  ;;  %965 = vst.msk [vmem:[%s1393_s4 + $0x6] sm:$0x3] %vm890_vm4, %v910_v61 }

// kernel: dc_decoder_forward.5
= control target key start
LH: loop header
LB: loop body
LE: loop exit
PB: predicated region body
PF: predicated region fallthrough
CT: control target
= control target key end

     0   :  { %vm22_vm0 = vcmask 1041408   ;;  %v1051_v0 = vmov 0.0   ;;  %vm1052_vm1 = vmmov 0   ;;  %vm18_vm2 = vcmask 31744   ;;  %s1262_s0 = inlined_call_operand.vmem [shape: bf16[9,4,128], index: 0, kind: input, shape index: {}]   ;;  %s1263_s1 = inlined_call_operand.vmem [shape: bf16[16,3,4], index: 1, kind: input, shape index: {}]   ;;  %s1264_s2 = inlined_call_operand.vmem [shape: f32[4,3,128], index: 2, kind: output, shape index: {}]  }
   0x1   :  { %905 = vmatprep.subr.bf16.mxu0 %v1051_v0  ;;  %929 = vmatprep.subr.bf16.mxu1 %v1051_v0  ;;  %v825_v1 = vld [vmem:[%s1262_s0 + $0x2] sm:$0x3]  ;;  %v837_v2 = vld [vmem:[%s1262_s0 + $0x4] sm:$0x3]  ;;  %v13_v5 = vld [vmem:[%s1262_s0] sm:$0x3] }
   0x2   :  { %v24_v3 = vsel %vm22_vm0, %v825_v1, 0  ;;  %v226_v4 = vsel %vm22_vm0, %v837_v2, 0  ;;  %907 = vmatprep.mubr.msk.bf16.mxu0 %vm1052_vm1, %v1051_v0  ;;  %931 = vmatprep.mubr.msk.bf16.mxu1 %vm1052_vm1, %v1051_v0  ;;  %v824_v6 = vld [vmem:[%s1263_s1 + $0x2] sm:$0x3]  ;;  %v836_v7 = vld [vmem:[%s1263_s1 + $0xa] sm:$0x3] }
   0x3   :  { %906 = vmatpush3.bf16.msra.mxu0 %v24_v3  ;;  %930 = vmatpush3.bf16.msra.mxu1 %v226_v4  ;;  %v835_v8 = vld [vmem:[%s1262_s0 + $0x2] sm:$0x3]  ;;  %v70_v9 = vsel %vm22_vm0, %v13_v5, 0  ;;  %v829_v11 = vld [vmem:[%s1262_s0 + $0x6] sm:$0x3] }
   0x4   :  { %911 = vmatprep.subr.bf16.mxu0 %v1051_v0  ;;  %935 = vmatprep.subr.bf16.mxu1 %v1051_v0  ;;  %v272_v10 = vsel %vm22_vm0, %v835_v8, 0  ;;  %v841_v12 = vld [vmem:[%s1262_s0 + $0x8] sm:$0x3]  ;;  %v12_v13 = vld [vmem:[%s1263_s1] sm:$0x3]  ;;  %v120_v18 = vsel %vm22_vm0, %v829_v11, 0 }
   0x5   :  { %v857_v14 = vld [vmem:[%s1262_s0 + $0xe] sm:$0x3]  ;;  %v834_v15 = vld [vmem:[%s1263_s1 + $0x8] sm:$0x3]  ;;  %v870_v17 = vld [vmem:[%s1262_s0 + $0x10] sm:$0x3] }
   0x6   :  { %908 = vmatmul.mubr.msk.bf16.vlgmr.msra.gmra.mrb[0].mxu0 %vm18_vm2, %v824_v6  ;;  %932 = vmatmul.mubr.msk.bf16.vlgmr.msra.gmra.mrb[0].mxu1 %vm18_vm2, %v836_v7  ;;  %v1122_v16 = vsel %vm22_vm0, %v857_v14, 0  ;;  %v321_v19 = vsel %vm22_vm0, %v841_v12, 0  ;;  %v1130_v20 = vsel %vm22_vm0, %v870_v17, 0  ;;  %v832_v21 = vld [vmem:[%s1262_s0 + $0x8] sm:$0x3] }
   0x7   :  { %912 = vmatpush3.bf16.msra.mxu0 %v70_v9  ;;  %936 = vmatpush3.bf16.msra.mxu1 %v272_v10  ;;  %v844_v22 = vld [vmem:[%s1262_s0 + $0xa] sm:$0x3]  ;;  %v828_v23 = vld [vmem:[%s1263_s1 + $0x4] sm:$0x3]  ;;  %v840_v24 = vld [vmem:[%s1263_s1 + $0xc] sm:$0x3] }
   0x8   :  { %913 = vmatprep.mubr.msk.bf16.mxu0 %vm1052_vm1, %v1051_v0  ;;  %937 = vmatprep.mubr.msk.bf16.mxu1 %vm1052_vm1, %v1051_v0  ;;  %v171_v25 = vsel %vm22_vm0, %v832_v21, 0  ;;  %v372_v26 = vsel %vm22_vm0, %v844_v22, 0  ;;  %v850_v27 = vld [vmem:[%s1262_s0 + $0x8] sm:$0x3]  ;;  %v863_v28 = vld [vmem:[%s1262_s0 + $0xa] sm:$0x3] }
   0x9   :  { %917 = vmatprep.subr.bf16.mxu0 %v1051_v0  ;;  %941 = vmatprep.subr.bf16.mxu1 %v1051_v0  ;;  %v831_v29 = vld [vmem:[%s1263_s1 + $0x6] sm:$0x3]  ;;  %v843_v30 = vld [vmem:[%s1263_s1 + $0xe] sm:$0x3]  ;;  %v427_v31 = vsel %vm22_vm0, %v850_v27, 0  ;;  %v629_v32 = vsel %vm22_vm0, %v863_v28, 0 }
   0xa   :  { %v848_v33 = vld [vmem:[%s1262_s0 + $0x6] sm:$0x3]  ;;  %v861_v34 = vld [vmem:[%s1262_s0 + $0x8] sm:$0x3]  ;;  %v849_v35 = vld [vmem:[%s1263_s1 + $0x12] sm:$0x3] }
   0xb   :  { %v862_v36 = vld [vmem:[%s1263_s1 + $0x1a] sm:$0x3]  ;;  %v473_v37 = vsel %vm22_vm0, %v848_v33, 0  ;;  %v675_v38 = vsel %vm22_vm0, %v861_v34, 0  ;;  %v854_v39 = vld [vmem:[%s1262_s0 + $0xc] sm:$0x3] }
   0xc   :  { %v867_v40 = vld [vmem:[%s1262_s0 + $0xe] sm:$0x3]  ;;  %v847_v41 = vld [vmem:[%s1263_s1 + $0x10] sm:$0x3]  ;;  %v860_v42 = vld [vmem:[%s1263_s1 + $0x18] sm:$0x3] }
   0xd   :  { %v523_v43 = vsel %vm22_vm0, %v854_v39, 0  ;;  %v724_v44 = vsel %vm22_vm0, %v867_v40, 0  ;;  %v853_v45 = vld [vmem:[%s1263_s1 + $0x14] sm:$0x3]  ;;  %v866_v46 = vld [vmem:[%s1263_s1 + $0x1c] sm:$0x3] }
   0xe   :  { %v856_v47 = vld [vmem:[%s1263_s1 + $0x16] sm:$0x3]  ;;  %v869_v48 = vld [vmem:[%s1263_s1 + $0x1e] sm:$0x3] }
  0x12   :  { %914 = vmatmul.mubr.msk.bf16.vlgmr.msra.gmra.mrb[0].mxu0 %vm18_vm2, %v12_v13  ;;  %938 = vmatmul.mubr.msk.bf16.vlgmr.msra.gmra.mrb[0].mxu1 %vm18_vm2, %v834_v15 }
  0x13   :  { %918 = vmatpush3.bf16.msra.mxu0 %v120_v18  ;;  %942 = vmatpush3.bf16.msra.mxu1 %v321_v19 }
  0x14   :  { %919 = vmatprep.mubr.msk.bf16.mxu0 %vm1052_vm1, %v1051_v0  ;;  %943 = vmatprep.mubr.msk.bf16.mxu1 %vm1052_vm1, %v1051_v0 }
  0x15   :  { %923 = vmatprep.subr.bf16.mxu0 %v1051_v0  ;;  %947 = vmatprep.subr.bf16.mxu1 %v1051_v0 }
  0x1e   :  { %920 = vmatmul.mubr.msk.bf16.vlgmr.msra.gmra.mrb[0].mxu0 %vm18_vm2, %v828_v23  ;;  %944 = vmatmul.mubr.msk.bf16.vlgmr.msra.gmra.mrb[0].mxu1 %vm18_vm2, %v840_v24 }
  0x1f   :  { %924 = vmatpush3.bf16.msra.mxu0 %v171_v25  ;;  %948 = vmatpush3.bf16.msra.mxu1 %v372_v26 }
  0x20   :  { %925 = vmatprep.mubr.msk.bf16.mxu0 %vm1052_vm1, %v1051_v0  ;;  %949 = vmatprep.mubr.msk.bf16.mxu1 %vm1052_vm1, %v1051_v0 }
  0x21   :  { %953 = vmatprep.subr.bf16.mxu0 %v1051_v0  ;;  %977 = vmatprep.subr.bf16.mxu1 %v1051_v0 }
  0x2a   :  { %926 = vmatmul.mubr.msk.bf16.vlgmr.msra.gmra.mrb[0].mxu0 %vm18_vm2, %v831_v29  ;;  %950 = vmatmul.mubr.msk.bf16.vlgmr.msra.gmra.mrb[0].mxu1 %vm18_vm2, %v843_v30 }
  0x2b   :  { %954 = vmatpush3.bf16.msra.mxu0 %v427_v31  ;;  %978 = vmatpush3.bf16.msra.mxu1 %v629_v32 }
  0x2c   :  { %955 = vmatprep.mubr.msk.bf16.mxu0 %vm1052_vm1, %v1051_v0  ;;  %979 = vmatprep.mubr.msk.bf16.mxu1 %vm1052_vm1, %v1051_v0 }
  0x2d   :  { %959 = vmatprep.subr.bf16.mxu0 %v1051_v0  ;;  %983 = vmatprep.subr.bf16.mxu1 %v1051_v0 }
  0x32   :  { %956 = vmatmul.mubr.msk.bf16.vlgmr.msra.gmra.mrb[4].mxu0 %vm18_vm2, %v849_v35  ;;  %980 = vmatmul.mubr.msk.bf16.vlgmr.msra.gmra.mrb[4].mxu1 %vm18_vm2, %v862_v36 }
  0x33   :  { %960 = vmatpush3.bf16.msra.mxu0 %v473_v37  ;;  %984 = vmatpush3.bf16.msra.mxu1 %v675_v38 }
  0x34   :  { %961 = vmatprep.mubr.msk.bf16.mxu0 %vm1052_vm1, %v1051_v0  ;;  %985 = vmatprep.mubr.msk.bf16.mxu1 %vm1052_vm1, %v1051_v0 }
  0x35   :  { %965 = vmatprep.subr.bf16.mxu0 %v1051_v0  ;;  %989 = vmatprep.subr.bf16.mxu1 %v1051_v0 }
  0x3e   :  { %962 = vmatmul.mubr.msk.bf16.vlgmr.msra.gmra.mrb[4].mxu0 %vm18_vm2, %v847_v41  ;;  %986 = vmatmul.mubr.msk.bf16.vlgmr.msra.gmra.mrb[4].mxu1 %vm18_vm2, %v860_v42 }
  0x3f   :  { %966 = vmatpush3.bf16.msra.mxu0 %v523_v43  ;;  %990 = vmatpush3.bf16.msra.mxu1 %v724_v44 }
  0x40   :  { %967 = vmatprep.mubr.msk.bf16.mxu0 %vm1052_vm1, %v1051_v0  ;;  %991 = vmatprep.mubr.msk.bf16.mxu1 %vm1052_vm1, %v1051_v0 }
  0x41   :  { %971 = vmatprep.subr.bf16.mxu0 %v1051_v0  ;;  %995 = vmatprep.subr.bf16.mxu1 %v1051_v0 }
  0x4a   :  { %968 = vmatmul.mubr.msk.bf16.vlgmr.msra.gmra.mrb[4].mxu0 %vm18_vm2, %v853_v45  ;;  %992 = vmatmul.mubr.msk.bf16.vlgmr.msra.gmra.mrb[4].mxu1 %vm18_vm2, %v866_v46 }
  0x4b   :  { %972 = vmatpush3.bf16.msra.mxu0 %v1122_v16  ;;  %996 = vmatpush3.bf16.msra.mxu1 %v1130_v20 }
  0x4c   :  { %973 = vmatprep.mubr.msk.bf16.mxu0 %vm1052_vm1, %v1051_v0  ;;  %997 = vmatprep.mubr.msk.bf16.mxu1 %vm1052_vm1, %v1051_v0 }
  0x56   :  { %974 = vmatmul.mubr.msk.bf16.vlgmr.msra.gmra.mrb[4].mxu0 %vm18_vm2, %v856_v47  ;;  %998 = vmatmul.mubr.msk.bf16.vlgmr.msra.gmra.mrb[4].mxu1 %vm18_vm2, %v869_v48 }
  0xfd   :  { %v207_v49 = vpop.f32.mrb[0].mxu0  ;;  %v408_v50 = vpop.f32.mrb[0].mxu1 }
  0xfe   :  { %214 = vst [vmem:[%s1264_s2] sm:$0x7] %v207_v49  ;;  %846 = vst [vmem:[%s1264_s2 + $0x4] sm:$0x7] %v408_v50  ;;  %v927_v51 = vpop.f32.mrb[1].mxu0  ;;  %v951_v52 = vpop.f32.mrb[1].mxu1 }
  0xff   :  { %v210_v53 = vpop.f32.mrb[2].mxu0  ;;  %v411_v54 = vpop.f32.mrb[2].mxu1 }
 0x100   :  { %v928_v55 = vpop.f32.mrb[3].mxu0  ;;  %v952_v56 = vpop.f32.mrb[3].mxu1 }
 0x129   :  { %v610_v57 = vpop.f32.mrb[4].mxu0  ;;  %v811_v58 = vpop.f32.mrb[4].mxu1 }
 0x12a   :  { %859 = vst [vmem:[%s1264_s2 + $0x8] sm:$0x7] %v610_v57  ;;  %872 = vst [vmem:[%s1264_s2 + $0xc] sm:$0x7] %v811_v58  ;;  %v975_v59 = vpop.f32.mrb[5].mxu0  ;;  %v999_v60 = vpop.f32.mrb[5].mxu1 }
 0x12b   :  { %v613_v61 = vpop.f32.mrb[6].mxu0  ;;  %v814_v62 = vpop.f32.mrb[6].mxu1 }
 0x12c   :  { %v976_v63 = vpop.f32.mrb[7].mxu0  ;;  %v1000_v0 = vpop.f32.mrb[7].mxu1 }

</bundles_post_ra>
